<compile_context>
chip_gen: v6e
topology: v6e:2x2x1
jax: 0.10.0
libtpu: 0.0.40
codegen_flags: <defaults>
</compile_context>

<pallas_src>
import jax
import jax.numpy as jnp
from jax import lax
from jax.experimental import pallas as pl
from jax.experimental.pallas import tpu as pltpu

BN_EPS = 1e-5


# ------------------------------ Pallas kernels -------------------------------

def _conv_stats_kernel(xt_ref, w_ref, y_ref, s_ref, sq_ref):
    """Fused 3x3-conv tile + per-channel partial sum / sum-of-squares.

    xt_ref : (1, 1, th+2, W+2, Cin)   halo tile of the zero-padded input
    w_ref  : (9*Cin, Cout)            conv weights, 9 taps stacked along K
    y_ref  : (1, th*W, Cout)          conv output tile (pre-BN)
    s_ref  : (1, 1, Cout)             per-tile per-channel sum
    sq_ref : (1, 1, Cout)             per-tile per-channel sum of squares
    """
    th = xt_ref.shape[2] - 2
    w = xt_ref.shape[3] - 2
    cin = xt_ref.shape[4]

    x = xt_ref[0, 0]                                   # (th+2, W+2, Cin)
    taps = []
    for ky in range(3):
        for kx in range(3):
            taps.append(x[ky:ky + th, kx:kx + w, :])   # (th, W, Cin)

    # Single fused contraction on the MXU: (th*W, 9*Cin) @ (9*Cin, Cout).
    p = jnp.concatenate(taps, axis=-1)                 # (th, W, 9*Cin)
    p = p.reshape(th * w, 9 * cin)                     # layout no-op when W % 8 == 0
    acc = jnp.dot(p, w_ref[...], preferred_element_type=jnp.float32)

    y_ref[0] = acc
    s_ref[0] = jnp.sum(acc, axis=0, keepdims=True)
    sq_ref[0] = jnp.sum(acc * acc, axis=0, keepdims=True)


def _bn_relu_kernel(y_ref, scale_ref, shift_ref, o_ref):
    """Fused y*scale + shift + ReLU on a lane-dense (rows, fold*C) view."""
    o_ref[...] = jnp.maximum(y_ref[...] * scale_ref[...] + shift_ref[...], 0.0)


# ------------------------------ tiling helpers --------------------------------

def _pick_tile_h(h, w, cin, cout, budget_bytes=8 << 20):
    """Largest divisor of H whose per-tile working set stays well under VMEM."""
    best = 1
    for th in range(1, h + 1):
        if h % th:
            continue
        rows = th * w
        need = 4 * (rows * 9 * cin                      # in-kernel patch matrix
                    + 2 * (th + 2) * (w + 2) * cin      # double-buffered halo tile
                    + 2 * rows * cout)                  # double-buffered output tile
        if need <= budget_bytes:
            best = th
    return best


def _pick_fold(m, c):
    """Fold factor f so the (M, C) elementwise pass runs as (M/f, f*C)
    with a lane-dense (multiple-of-128) last dim."""
    if c % 128 == 0:
        return 1
    for f in (2, 4, 8, 16, 32, 64, 128):
        if (f * c) % 128 == 0 and m % f == 0:
            return f
    return 1


def _pick_tile_rows(rows):
    for cand in (2048, 1024, 512, 256, 128, 64, 32, 16, 8):
        if rows % cand == 0:
            return cand
    return rows


# ------------------------------ one conv stage --------------------------------

def conv3x3_bn_relu(x_nhwc, w_hwio, gamma, beta, tile_h=None):
    """Conv3x3(pad=1, no bias) + BatchNorm2d(batch stats) + ReLU, NHWC in/out."""
    n, h, w, cin = x_nhwc.shape
    cout = w_hwio.shape[-1]
    m = n * h * w

    th = tile_h if tile_h is not None else _pick_tile_h(h, w, cin, cout)
    assert h % th == 0, f"tile_h={th} must divide H={h}"
    hb = h // th
    nb = n * hb
    tile_m = th * w

    # Zero-pad (padding=1) and build the halo-tiled view: each row-tile gets its
    # own (th+2, W+2) halo slab so the kernel's BlockSpec stays a plain
    # non-overlapping block (auto double-buffered DMA).
    xp = jnp.pad(x_nhwc, ((0, 0), (1, 1), (1, 1), (0, 0)))
    xt = jnp.stack([xp[:, i * th:i * th + th + 2] for i in range(hb)], axis=1)
    # xt: (N, HB, th+2, W+2, Cin)

    w2 = w_hwio.reshape(9 * cin, cout)          # (3,3,Cin,Cout) -> (9*Cin, Cout)

    y, s_part, sq_part = pl.pallas_call(
        _conv_stats_kernel,
        out_shape=(
            jax.ShapeDtypeStruct((nb, tile_m, cout), jnp.float32),
            jax.ShapeDtypeStruct((nb, 1, cout), jnp.float32),
            jax.ShapeDtypeStruct((nb, 1, cout), jnp.float32),
        ),
        grid=(n, hb),
        in_specs=[
            pl.BlockSpec((1, 1, th + 2, w + 2, cin),
                         lambda i, j: (i, j, 0, 0, 0)),
            pl.BlockSpec((9 * cin, cout), lambda i, j: (0, 0)),
        ],
        out_specs=(
            pl.BlockSpec((1, tile_m, cout), lambda i, j: (i * hb + j, 0, 0)),
            pl.BlockSpec((1, 1, cout), lambda i, j: (i * hb + j, 0, 0)),
            pl.BlockSpec((1, 1, cout), lambda i, j: (i * hb + j, 0, 0)),
        ),
        compiler_params=pltpu.CompilerParams(
            dimension_semantics=("parallel", "parallel")),
    )(xt, w2)

    # Exact global BatchNorm statistics from the per-tile partial sums
    # (per-channel vectors only; negligible work).
    mean = jnp.sum(s_part, axis=(0, 1)) / m
    var = jnp.maximum(jnp.sum(sq_part, axis=(0, 1)) / m - mean * mean, 0.0)
    scale = gamma * lax.rsqrt(var + BN_EPS)
    shift = beta - mean * scale

    # Pass 2: fused scale/shift/ReLU on a lane-dense folded view of y.
    f = _pick_fold(m, cout)
    rows = m // f
    tile_r = _pick_tile_rows(rows)
    y2 = y.reshape(rows, f * cout)                        # contiguous, free reshape
    scale2 = jnp.tile(scale, f).reshape(1, f * cout)
    shift2 = jnp.tile(shift, f).reshape(1, f * cout)

    out = pl.pallas_call(
        _bn_relu_kernel,
        out_shape=jax.ShapeDtypeStruct((rows, f * cout), jnp.float32),
        grid=(rows // tile_r,),
        in_specs=[
            pl.BlockSpec((tile_r, f * cout), lambda i: (i, 0)),
            pl.BlockSpec((1, f * cout), lambda i: (0, 0)),
            pl.BlockSpec((1, f * cout), lambda i: (0, 0)),
        ],
        out_specs=pl.BlockSpec((tile_r, f * cout), lambda i: (i, 0)),
        compiler_params=pltpu.CompilerParams(
            dimension_semantics=("parallel",)),
    )(y2, scale2, shift2)

    return out.reshape(n, h, w, cout)


# ------------------------------ full module -----------------------------------

def flexible_double_conv(x_nchw, params, tile_h=None):
    """Matches FlexibleDoubleConv.forward; input/output are NCHW like PyTorch."""
    x = jnp.transpose(x_nchw, (0, 2, 3, 1)).astype(jnp.float32)    # NCHW -> NHWC
    # TODO(synk): fuse each stage's BN+ReLU into the next stage's conv kernel
    # (normalize the halo tile in VMEM) to drop one HBM round trip of the
    # intermediate activation.
    h1 = conv3x3_bn_relu(x, params["w1"], params["g1"], params["b1"], tile_h)
    h2 = conv3x3_bn_relu(h1, params["w2"], params["g2"], params["b2"], tile_h)
    return jnp.transpose(h2, (0, 3, 1, 2))                         # NHWC -> NCHW


# ---------------- pure-JAX reference (for correctness check) ------------------

def _reference(x_nchw, params):
    def conv(x, w_hwio):
        w_oihw = jnp.transpose(w_hwio, (3, 2, 0, 1))  # (3,3,Cin,Cout)->(Cout,Cin,3,3)
        return lax.conv_general_dilated(
            x, w_oihw, window_strides=(1, 1), padding=((1, 1), (1, 1)),
            dimension_numbers=("NCHW", "OIHW", "NCHW"))

    def bn_relu(y, g, b):
        mean = jnp.mean(y, axis=(0, 2, 3), keepdims=True)
        var = jnp.mean((y - mean) ** 2, axis=(0, 2, 3), keepdims=True)
        yn = (y - mean) * lax.rsqrt(var + BN_EPS)
        yn = yn * g.reshape(1, -1, 1, 1) + b.reshape(1, -1, 1, 1)
        return jnp.maximum(yn, 0.0)

    y = bn_relu(conv(x_nchw, params["w1"]), params["g1"], params["b1"])
    y = bn_relu(conv(y, params["w2"]), params["g2"], params["b2"])
    return y


if __name__ == "__main__":
    # FlexibleDoubleConv(in_channels=4, out_channels=8) -> middle_channels = 8
    N, Cin, H, W = 2, 4, 16, 16
    Cmid, Cout = 8, 8

    key = jax.random.PRNGKey(0)
    k1, k2, k3, k4, k5 = jax.random.split(key, 5)
    params = {
        # conv weights stored as (kh, kw, Cin, Cout)
        "w1": jax.random.normal(k1, (3, 3, Cin, Cmid), jnp.float32) * 0.2,
        "g1": 1.0 + 0.1 * jax.random.normal(k2, (Cmid,), jnp.float32),
        "b1": 0.1 * jax.random.normal(k3, (Cmid,), jnp.float32),
        "w2": jax.random.normal(k4, (3, 3, Cmid, Cout), jnp.float32) * 0.2,
        "g2": jnp.ones((Cout,), jnp.float32),
        "b2": jnp.zeros((Cout,), jnp.float32),
    }
    x = jax.random.normal(k5, (N, Cin, H, W), jnp.float32)   # NCHW, like PyTorch

    fwd = jax.jit(flexible_double_conv, static_argnames=("tile_h",))
    # tile_h=8 exercises the multi-row-tile halo path (2 row tiles x 2 images).
    out = jax.block_until_ready(fwd(x, params, tile_h=8))
    ref = jax.block_until_ready(_reference(x, params))

    assert out.shape == (N, Cout, H, W), out.shape
    if not jnp.allclose(out, ref, atol=1e-3, rtol=1e-3):
        err = float(jnp.max(jnp.abs(out - ref)))
        raise AssertionError(
            f"Pallas kernel output mismatch vs JAX reference (max err {err})")
    print("KERNEL_OK")
</pallas_src>

<mosaic_0001>
module attributes {stable_mosaic.version = 11 : i64} {
  func.func @_conv_stats_kernel(%arg0: i32, %arg1: i32, %arg2: memref<1x1x10x18x4xf32, #tpu.memory_space<vmem>>, %arg3: memref<36x8xf32, #tpu.memory_space<vmem>>, %arg4: memref<1x128x8xf32, #tpu.memory_space<vmem>>, %arg5: memref<1x1x8xf32, #tpu.memory_space<vmem>>, %arg6: memref<1x1x8xf32, #tpu.memory_space<vmem>>) attributes {dimension_semantics = [#tpu.dimension_semantics<parallel>, #tpu.dimension_semantics<parallel>], iteration_bounds = array<i64: 2, 2>, scalar_prefetch = 0 : i64, scratch_operands = 0 : i64, tpu.core_type = #tpu.core_type<tc>, window_params = [{transform_indices = @transform_0, window_bounds = array<i64: 1, 1, 10, 18, 4>}, {pipeline_mode = #tpu.pipeline_mode<synchronous>, transform_indices = @transform_1, window_bounds = array<i64: 36, 8>}, {transform_indices = @transform_2, window_bounds = array<i64: 1, 128, 8>}, {transform_indices = @transform_3, window_bounds = array<i64: 1, 1, 8>}, {transform_indices = @transform_4, window_bounds = array<i64: 1, 1, 8>}]} {
    %c0 = arith.constant 0 : index
    %c0_0 = arith.constant 0 : index
    %c0_1 = arith.constant 0 : index
    %c0_2 = arith.constant 0 : index
    %c0_3 = arith.constant 0 : index
    %0 = vector.load %arg2[%c0, %c0_0, %c0_1, %c0_2, %c0_3] : memref<1x1x10x18x4xf32, #tpu.memory_space<vmem>>, vector<1x1x10x18x4xf32>
    %1 = vector.shape_cast %0 : vector<1x1x10x18x4xf32> to vector<10x18x4xf32>
    %2 = vector.extract_strided_slice %1 {offsets = [0, 0, 0], sizes = [8, 16, 4], strides = [1, 1, 1]} : vector<10x18x4xf32> to vector<8x16x4xf32>
    %3 = vector.extract_strided_slice %1 {offsets = [0, 1, 0], sizes = [8, 16, 4], strides = [1, 1, 1]} : vector<10x18x4xf32> to vector<8x16x4xf32>
    %4 = vector.extract_strided_slice %1 {offsets = [0, 2, 0], sizes = [8, 16, 4], strides = [1, 1, 1]} : vector<10x18x4xf32> to vector<8x16x4xf32>
    %5 = vector.extract_strided_slice %1 {offsets = [1, 0, 0], sizes = [8, 16, 4], strides = [1, 1, 1]} : vector<10x18x4xf32> to vector<8x16x4xf32>
    %6 = vector.extract_strided_slice %1 {offsets = [1, 1, 0], sizes = [8, 16, 4], strides = [1, 1, 1]} : vector<10x18x4xf32> to vector<8x16x4xf32>
    %7 = vector.extract_strided_slice %1 {offsets = [1, 2, 0], sizes = [8, 16, 4], strides = [1, 1, 1]} : vector<10x18x4xf32> to vector<8x16x4xf32>
    %8 = vector.extract_strided_slice %1 {offsets = [2, 0, 0], sizes = [8, 16, 4], strides = [1, 1, 1]} : vector<10x18x4xf32> to vector<8x16x4xf32>
    %9 = vector.extract_strided_slice %1 {offsets = [2, 1, 0], sizes = [8, 16, 4], strides = [1, 1, 1]} : vector<10x18x4xf32> to vector<8x16x4xf32>
    %10 = vector.extract_strided_slice %1 {offsets = [2, 2, 0], sizes = [8, 16, 4], strides = [1, 1, 1]} : vector<10x18x4xf32> to vector<8x16x4xf32>
    %11 = tpu.concatenate %2, %3, %4, %5, %6, %7, %8, %9, %10 in 2 : vector<8x16x4xf32>, vector<8x16x4xf32>, vector<8x16x4xf32>, vector<8x16x4xf32>, vector<8x16x4xf32>, vector<8x16x4xf32>, vector<8x16x4xf32>, vector<8x16x4xf32>, vector<8x16x4xf32> -> vector<8x16x36xf32>
    %12 = vector.shape_cast %11 : vector<8x16x36xf32> to vector<128x36xf32>
    %c0_4 = arith.constant 0 : index
    %c0_5 = arith.constant 0 : index
    %13 = vector.load %arg3[%c0_4, %c0_5] : memref<36x8xf32, #tpu.memory_space<vmem>>, vector<36x8xf32>
    %cst = arith.constant dense<0.000000e+00> : vector<128x8xf32>
    %14 = tpu.matmul %12, %13, %cst {dimension_numbers = #tpu.dot_dimension_numbers<[1], [0], [0], [1], [0, 0, 1, 1], [], []>} : vector<128x36xf32>, vector<36x8xf32>, vector<128x8xf32> -> vector<128x8xf32>
    %c0_6 = arith.constant 0 : index
    %c0_7 = arith.constant 0 : index
    %c0_8 = arith.constant 0 : index
    %15 = vector.load %arg4[%c0_6, %c0_7, %c0_8] : memref<1x128x8xf32, #tpu.memory_space<vmem>>, vector<1x128x8xf32>
    %16 = vector.shape_cast %15 : vector<1x128x8xf32> to vector<128x8xf32>
    %17 = vector.shape_cast %14 : vector<128x8xf32> to vector<1x128x8xf32>
    tpu.vector_store %arg4[%c0_6, %c0_7, %c0_8], %17 {strides = array<i32>} : memref<1x128x8xf32, #tpu.memory_space<vmem>>, vector<1x128x8xf32>,
    %cst_9 = arith.constant dense<0.000000e+00> : vector<8xf32>
    %18 = vector.multi_reduction <add>, %14, %cst_9 [0] : vector<128x8xf32> to vector<8xf32>
    %19 = vector.shape_cast %18 : vector<8xf32> to vector<1x8xf32>
    %c0_10 = arith.constant 0 : index
    %c0_11 = arith.constant 0 : index
    %c0_12 = arith.constant 0 : index
    %20 = vector.load %arg5[%c0_10, %c0_11, %c0_12] : memref<1x1x8xf32, #tpu.memory_space<vmem>>, vector<1x1x8xf32>
    %21 = vector.shape_cast %20 : vector<1x1x8xf32> to vector<1x8xf32>
    %22 = vector.shape_cast %19 : vector<1x8xf32> to vector<1x1x8xf32>
    tpu.vector_store %arg5[%c0_10, %c0_11, %c0_12], %22 {strides = array<i32>} : memref<1x1x8xf32, #tpu.memory_space<vmem>>, vector<1x1x8xf32>,
    %23 = arith.mulf %14, %14 : vector<128x8xf32>
    %cst_13 = arith.constant dense<0.000000e+00> : vector<8xf32>
    %24 = vector.multi_reduction <add>, %23, %cst_13 [0] : vector<128x8xf32> to vector<8xf32>
    %25 = vector.shape_cast %24 : vector<8xf32> to vector<1x8xf32>
    %c0_14 = arith.constant 0 : index
    %c0_15 = arith.constant 0 : index
    %c0_16 = arith.constant 0 : index
    %26 = vector.load %arg6[%c0_14, %c0_15, %c0_16] : memref<1x1x8xf32, #tpu.memory_space<vmem>>, vector<1x1x8xf32>
    %27 = vector.shape_cast %26 : vector<1x1x8xf32> to vector<1x8xf32>
    %28 = vector.shape_cast %25 : vector<1x8xf32> to vector<1x1x8xf32>
    tpu.vector_store %arg6[%c0_14, %c0_15, %c0_16], %28 {strides = array<i32>} : memref<1x1x8xf32, #tpu.memory_space<vmem>>, vector<1x1x8xf32>,
    return
  }
  func.func @transform_0(%arg0: i32, %arg1: i32) -> (i32, i32, i32, i32, i32) {
    %c0_i32 = arith.constant 0 : i32
    %c0_i32_0 = arith.constant 0 : i32
    %c0_i32_1 = arith.constant 0 : i32
    %c0_i32_2 = arith.constant 0 : i32
    return %arg0, %arg1, %c0_i32, %c0_i32_0, %c0_i32_1 : i32, i32, i32, i32, i32
  }
  func.func @transform_1(%arg0: i32, %arg1: i32) -> (i32, i32) {
    %c0_i32 = arith.constant 0 : i32
    %c0_i32_0 = arith.constant 0 : i32
    %c0_i32_1 = arith.constant 0 : i32
    return %c0_i32, %c0_i32_0 : i32, i32
  }
  func.func @transform_2(%arg0: i32, %arg1: i32) -> (i32, i32, i32) {
    %c2_i32 = arith.constant 2 : i32
    %0 = arith.muli %arg0, %c2_i32 : i32
    %1 = arith.addi %0, %arg1 : i32
    %c0_i32 = arith.constant 0 : i32
    %c0_i32_0 = arith.constant 0 : i32
    %c0_i32_1 = arith.constant 0 : i32
    return %1, %c0_i32, %c0_i32_0 : i32, i32, i32
  }
  func.func @transform_3(%arg0: i32, %arg1: i32) -> (i32, i32, i32) {
    %c2_i32 = arith.constant 2 : i32
    %0 = arith.muli %arg0, %c2_i32 : i32
    %1 = arith.addi %0, %arg1 : i32
    %c0_i32 = arith.constant 0 : i32
    %c0_i32_0 = arith.constant 0 : i32
    %c0_i32_1 = arith.constant 0 : i32
    return %1, %c0_i32, %c0_i32_0 : i32, i32, i32
  }
  func.func @transform_4(%arg0: i32, %arg1: i32) -> (i32, i32, i32) {
    %c2_i32 = arith.constant 2 : i32
    %0 = arith.muli %arg0, %c2_i32 : i32
    %1 = arith.addi %0, %arg1 : i32
    %c0_i32 = arith.constant 0 : i32
    %c0_i32_0 = arith.constant 0 : i32
    %c0_i32_1 = arith.constant 0 : i32
    return %1, %c0_i32, %c0_i32_0 : i32, i32, i32
  }
}

module attributes {stable_mosaic.version = 11 : i64} {
  func.func @_bn_relu_kernel(%arg0: i32, %arg1: memref<32x128xf32, #tpu.memory_space<vmem>>, %arg2: memref<1x128xf32, #tpu.memory_space<vmem>>, %arg3: memref<1x128xf32, #tpu.memory_space<vmem>>, %arg4: memref<32x128xf32, #tpu.memory_space<vmem>>) attributes {dimension_semantics = [#tpu.dimension_semantics<parallel>], iteration_bounds = array<i64: 1>, scalar_prefetch = 0 : i64, scratch_operands = 0 : i64, tpu.core_type = #tpu.core_type<tc>, window_params = [{transform_indices = @transform_0, window_bounds = array<i64: 32, 128>}, {pipeline_mode = #tpu.pipeline_mode<synchronous>, transform_indices = @transform_1, window_bounds = array<i64: 1, 128>}, {pipeline_mode = #tpu.pipeline_mode<synchronous>, transform_indices = @transform_2, window_bounds = array<i64: 1, 128>}, {transform_indices = @transform_3, window_bounds = array<i64: 32, 128>}]} {
    %c0 = arith.constant 0 : index
    %c0_0 = arith.constant 0 : index
    %0 = vector.load %arg1[%c0, %c0_0] : memref<32x128xf32, #tpu.memory_space<vmem>>, vector<32x128xf32>
    %c0_1 = arith.constant 0 : index
    %c0_2 = arith.constant 0 : index
    %1 = vector.load %arg2[%c0_1, %c0_2] : memref<1x128xf32, #tpu.memory_space<vmem>>, vector<1x128xf32>
    %2 = vector.broadcast %1 : vector<1x128xf32> to vector<32x128xf32>
    %3 = arith.mulf %0, %2 : vector<32x128xf32>
    %c0_3 = arith.constant 0 : index
    %c0_4 = arith.constant 0 : index
    %4 = vector.load %arg3[%c0_3, %c0_4] : memref<1x128xf32, #tpu.memory_space<vmem>>, vector<1x128xf32>
    %5 = vector.broadcast %4 : vector<1x128xf32> to vector<32x128xf32>
    %6 = arith.addf %3, %5 : vector<32x128xf32>
    %cst = arith.constant 0.000000e+00 : f32
    %7 = vector.broadcast %cst : f32 to vector<32x128xf32>
    %8 = arith.maximumf %6, %7 : vector<32x128xf32>
    %c0_5 = arith.constant 0 : index
    %c0_6 = arith.constant 0 : index
    %9 = vector.load %arg4[%c0_5, %c0_6] : memref<32x128xf32, #tpu.memory_space<vmem>>, vector<32x128xf32>
    tpu.vector_store %arg4[%c0_5, %c0_6], %8 {strides = array<i32>} : memref<32x128xf32, #tpu.memory_space<vmem>>, vector<32x128xf32>,
    return
  }
  func.func @transform_0(%arg0: i32) -> (i32, i32) {
    %c0_i32 = arith.constant 0 : i32
    %c0_i32_0 = arith.constant 0 : i32
    return %arg0, %c0_i32 : i32, i32
  }
  func.func @transform_1(%arg0: i32) -> (i32, i32) {
    %c0_i32 = arith.constant 0 : i32
    %c0_i32_0 = arith.constant 0 : i32
    %c0_i32_1 = arith.constant 0 : i32
    return %c0_i32, %c0_i32_0 : i32, i32
  }
  func.func @transform_2(%arg0: i32) -> (i32, i32) {
    %c0_i32 = arith.constant 0 : i32
    %c0_i32_0 = arith.constant 0 : i32
    %c0_i32_1 = arith.constant 0 : i32
    return %c0_i32, %c0_i32_0 : i32, i32
  }
  func.func @transform_3(%arg0: i32) -> (i32, i32) {
    %c0_i32 = arith.constant 0 : i32
    %c0_i32_0 = arith.constant 0 : i32
    return %arg0, %c0_i32 : i32, i32
  }
}

module attributes {stable_mosaic.version = 11 : i64} {
  func.func @_conv_stats_kernel(%arg0: i32, %arg1: i32, %arg2: memref<1x1x10x18x8xf32, #tpu.memory_space<vmem>>, %arg3: memref<72x8xf32, #tpu.memory_space<vmem>>, %arg4: memref<1x128x8xf32, #tpu.memory_space<vmem>>, %arg5: memref<1x1x8xf32, #tpu.memory_space<vmem>>, %arg6: memref<1x1x8xf32, #tpu.memory_space<vmem>>) attributes {dimension_semantics = [#tpu.dimension_semantics<parallel>, #tpu.dimension_semantics<parallel>], iteration_bounds = array<i64: 2, 2>, scalar_prefetch = 0 : i64, scratch_operands = 0 : i64, tpu.core_type = #tpu.core_type<tc>, window_params = [{transform_indices = @transform_0, window_bounds = array<i64: 1, 1, 10, 18, 8>}, {pipeline_mode = #tpu.pipeline_mode<synchronous>, transform_indices = @transform_1, window_bounds = array<i64: 72, 8>}, {transform_indices = @transform_2, window_bounds = array<i64: 1, 128, 8>}, {transform_indices = @transform_3, window_bounds = array<i64: 1, 1, 8>}, {transform_indices = @transform_4, window_bounds = array<i64: 1, 1, 8>}]} {
    %c0 = arith.constant 0 : index
    %c0_0 = arith.constant 0 : index
    %c0_1 = arith.constant 0 : index
    %c0_2 = arith.constant 0 : index
    %c0_3 = arith.constant 0 : index
    %0 = vector.load %arg2[%c0, %c0_0, %c0_1, %c0_2, %c0_3] : memref<1x1x10x18x8xf32, #tpu.memory_space<vmem>>, vector<1x1x10x18x8xf32>
    %1 = vector.shape_cast %0 : vector<1x1x10x18x8xf32> to vector<10x18x8xf32>
    %2 = vector.extract_strided_slice %1 {offsets = [0, 0, 0], sizes = [8, 16, 8], strides = [1, 1, 1]} : vector<10x18x8xf32> to vector<8x16x8xf32>
    %3 = vector.extract_strided_slice %1 {offsets = [0, 1, 0], sizes = [8, 16, 8], strides = [1, 1, 1]} : vector<10x18x8xf32> to vector<8x16x8xf32>
    %4 = vector.extract_strided_slice %1 {offsets = [0, 2, 0], sizes = [8, 16, 8], strides = [1, 1, 1]} : vector<10x18x8xf32> to vector<8x16x8xf32>
    %5 = vector.extract_strided_slice %1 {offsets = [1, 0, 0], sizes = [8, 16, 8], strides = [1, 1, 1]} : vector<10x18x8xf32> to vector<8x16x8xf32>
    %6 = vector.extract_strided_slice %1 {offsets = [1, 1, 0], sizes = [8, 16, 8], strides = [1, 1, 1]} : vector<10x18x8xf32> to vector<8x16x8xf32>
    %7 = vector.extract_strided_slice %1 {offsets = [1, 2, 0], sizes = [8, 16, 8], strides = [1, 1, 1]} : vector<10x18x8xf32> to vector<8x16x8xf32>
    %8 = vector.extract_strided_slice %1 {offsets = [2, 0, 0], sizes = [8, 16, 8], strides = [1, 1, 1]} : vector<10x18x8xf32> to vector<8x16x8xf32>
    %9 = vector.extract_strided_slice %1 {offsets = [2, 1, 0], sizes = [8, 16, 8], strides = [1, 1, 1]} : vector<10x18x8xf32> to vector<8x16x8xf32>
    %10 = vector.extract_strided_slice %1 {offsets = [2, 2, 0], sizes = [8, 16, 8], strides = [1, 1, 1]} : vector<10x18x8xf32> to vector<8x16x8xf32>
    %11 = tpu.concatenate %2, %3, %4, %5, %6, %7, %8, %9, %10 in 2 : vector<8x16x8xf32>, vector<8x16x8xf32>, vector<8x16x8xf32>, vector<8x16x8xf32>, vector<8x16x8xf32>, vector<8x16x8xf32>, vector<8x16x8xf32>, vector<8x16x8xf32>, vector<8x16x8xf32> -> vector<8x16x72xf32>
    %12 = vector.shape_cast %11 : vector<8x16x72xf32> to vector<128x72xf32>
    %c0_4 = arith.constant 0 : index
    %c0_5 = arith.constant 0 : index
    %13 = vector.load %arg3[%c0_4, %c0_5] : memref<72x8xf32, #tpu.memory_space<vmem>>, vector<72x8xf32>
    %cst = arith.constant dense<0.000000e+00> : vector<128x8xf32>
    %14 = tpu.matmul %12, %13, %cst {dimension_numbers = #tpu.dot_dimension_numbers<[1], [0], [0], [1], [0, 0, 1, 1], [], []>} : vector<128x72xf32>, vector<72x8xf32>, vector<128x8xf32> -> vector<128x8xf32>
    %c0_6 = arith.constant 0 : index
    %c0_7 = arith.constant 0 : index
    %c0_8 = arith.constant 0 : index
    %15 = vector.load %arg4[%c0_6, %c0_7, %c0_8] : memref<1x128x8xf32, #tpu.memory_space<vmem>>, vector<1x128x8xf32>
    %16 = vector.shape_cast %15 : vector<1x128x8xf32> to vector<128x8xf32>
    %17 = vector.shape_cast %14 : vector<128x8xf32> to vector<1x128x8xf32>
    tpu.vector_store %arg4[%c0_6, %c0_7, %c0_8], %17 {strides = array<i32>} : memref<1x128x8xf32, #tpu.memory_space<vmem>>, vector<1x128x8xf32>,
    %cst_9 = arith.constant dense<0.000000e+00> : vector<8xf32>
    %18 = vector.multi_reduction <add>, %14, %cst_9 [0] : vector<128x8xf32> to vector<8xf32>
    %19 = vector.shape_cast %18 : vector<8xf32> to vector<1x8xf32>
    %c0_10 = arith.constant 0 : index
    %c0_11 = arith.constant 0 : index
    %c0_12 = arith.constant 0 : index
    %20 = vector.load %arg5[%c0_10, %c0_11, %c0_12] : memref<1x1x8xf32, #tpu.memory_space<vmem>>, vector<1x1x8xf32>
    %21 = vector.shape_cast %20 : vector<1x1x8xf32> to vector<1x8xf32>
    %22 = vector.shape_cast %19 : vector<1x8xf32> to vector<1x1x8xf32>
    tpu.vector_store %arg5[%c0_10, %c0_11, %c0_12], %22 {strides = array<i32>} : memref<1x1x8xf32, #tpu.memory_space<vmem>>, vector<1x1x8xf32>,
    %23 = arith.mulf %14, %14 : vector<128x8xf32>
    %cst_13 = arith.constant dense<0.000000e+00> : vector<8xf32>
    %24 = vector.multi_reduction <add>, %23, %cst_13 [0] : vector<128x8xf32> to vector<8xf32>
    %25 = vector.shape_cast %24 : vector<8xf32> to vector<1x8xf32>
    %c0_14 = arith.constant 0 : index
    %c0_15 = arith.constant 0 : index
    %c0_16 = arith.constant 0 : index
    %26 = vector.load %arg6[%c0_14, %c0_15, %c0_16] : memref<1x1x8xf32, #tpu.memory_space<vmem>>, vector<1x1x8xf32>
    %27 = vector.shape_cast %26 : vector<1x1x8xf32> to vector<1x8xf32>
    %28 = vector.shape_cast %25 : vector<1x8xf32> to vector<1x1x8xf32>
    tpu.vector_store %arg6[%c0_14, %c0_15, %c0_16], %28 {strides = array<i32>} : memref<1x1x8xf32, #tpu.memory_space<vmem>>, vector<1x1x8xf32>,
    return
  }
  func.func @transform_0(%arg0: i32, %arg1: i32) -> (i32, i32, i32, i32, i32) {
    %c0_i32 = arith.constant 0 : i32
    %c0_i32_0 = arith.constant 0 : i32
    %c0_i32_1 = arith.constant 0 : i32
    %c0_i32_2 = arith.constant 0 : i32
    return %arg0, %arg1, %c0_i32, %c0_i32_0, %c0_i32_1 : i32, i32, i32, i32, i32
  }
  func.func @transform_1(%arg0: i32, %arg1: i32) -> (i32, i32) {
    %c0_i32 = arith.constant 0 : i32
    %c0_i32_0 = arith.constant 0 : i32
    %c0_i32_1 = arith.constant 0 : i32
    return %c0_i32, %c0_i32_0 : i32, i32
  }
  func.func @transform_2(%arg0: i32, %arg1: i32) -> (i32, i32, i32) {
    %c2_i32 = arith.constant 2 : i32
    %0 = arith.muli %arg0, %c2_i32 : i32
    %1 = arith.addi %0, %arg1 : i32
    %c0_i32 = arith.constant 0 : i32
    %c0_i32_0 = arith.constant 0 : i32
    %c0_i32_1 = arith.constant 0 : i32
    return %1, %c0_i32, %c0_i32_0 : i32, i32, i32
  }
  func.func @transform_3(%arg0: i32, %arg1: i32) -> (i32, i32, i32) {
    %c2_i32 = arith.constant 2 : i32
    %0 = arith.muli %arg0, %c2_i32 : i32
    %1 = arith.addi %0, %arg1 : i32
    %c0_i32 = arith.constant 0 : i32
    %c0_i32_0 = arith.constant 0 : i32
    %c0_i32_1 = arith.constant 0 : i32
    return %1, %c0_i32, %c0_i32_0 : i32, i32, i32
  }
  func.func @transform_4(%arg0: i32, %arg1: i32) -> (i32, i32, i32) {
    %c2_i32 = arith.constant 2 : i32
    %0 = arith.muli %arg0, %c2_i32 : i32
    %1 = arith.addi %0, %arg1 : i32
    %c0_i32 = arith.constant 0 : i32
    %c0_i32_0 = arith.constant 0 : i32
    %c0_i32_1 = arith.constant 0 : i32
    return %1, %c0_i32, %c0_i32_0 : i32, i32, i32
  }
}

</mosaic_0001>

<bundles_post_ra>
// kernel: tile.23
= control target key start
LH: loop header
LB: loop body
LE: loop exit
PB: predicated region body
PF: predicated region fallthrough
CT: control target
= control target key end

     0   :  { %s28_s0 = inlined_call_operand.vmem [shape: f32[8], index: 0, kind: input, shape index: {}]   ;;  %s29_s1 = inlined_call_operand.vmem [shape: f32[16,8], index: 1, kind: output, shape index: {}]  }
   0x1   :  { %v4_v0 = vld [vmem:[%s28_s0] ss:$0 sm:$0xff] }
   0x2   :  { %5 = vst [vmem:[%s29_s1] sm:$0xff] %v4_v0  ;;  %8 = vst [vmem:[%s29_s1 + $0x8] sm:$0xff] %v4_v0 }

// kernel: tile.24
= control target key start
LH: loop header
LB: loop body
LE: loop exit
PB: predicated region body
PF: predicated region fallthrough
CT: control target
= control target key end

     0   :  { %s133_s10 = smov 120   ;;  %s134_s11 = smov 104   ;;  %vm3_vm0 = vcmask 64512   ;;  %vm9_vm1 = vcmask 1048512   ;;  %vm15_vm2 = vcmask 982912   ;;  %vm21_vm3 = vcmask 917312   ;;  %s209_s0 = inlined_call_operand.vmem [shape: f32[16,8], index: 0, kind: input, shape index: {}]   ;;  %s210_s1 = inlined_call_operand.vmem [shape: f32[1,128], index: 1, kind: output, shape index: {}]  }
   0x1   :  { %v103_v0 = vld [vmem:[%s209_s0 + $0xf] sm:$0x1]   ;;  %v105_v1 = vld [vmem:[%s209_s0 + $0xd] sm:$0x1]   ;;  %v104_v2 = vld [vmem:[%s209_s0 + $0xe] sm:$0x1]  }
   0x2   :  { %7 = vrot.lane.b32.xlu0 %v103_v0, %s133_s10  ;;  %19 = vrot.lane.b32.xlu1 %v105_v1, %s134_s11  ;;  %v106_v3 = vld [vmem:[%s209_s0 + $0xc] sm:$0x1]   ;;  %s135_s16 = smov 112   ;;  %s136_s17 = smov 96   ;;  %v107_v4 = vld [vmem:[%s209_s0 + $0xb] sm:$0x1]  }
   0x3   :  { %v108_v5 = vld [vmem:[%s209_s0 + $0xa] sm:$0x1]   ;;  %v2_v6 = vld [vmem:[%s209_s0] sm:$0x1]   ;;  %s137_s24 = smov 88   ;;  %s138_s25 = smov 80  }
   0x4   :  { %4 = vst.msk [vmem:[#allocation0] sm:$0x1] %vm3_vm0, %v2_v6   ;;  %v109_v7 = vld [vmem:[%s209_s0 + $0x9] sm:$0x1]   ;;  %v110_v8 = vld [vmem:[%s209_s0 + $0x8] sm:$0x1]  }
   0x5   :  { %s139_s30 = smov 72   ;;  %s140_s2 = smov 64   ;;  %v111_v9 = vld [vmem:[%s209_s0 + $0x7] sm:$0x1]   ;;  %v112_v10 = vld [vmem:[%s209_s0 + $0x6] sm:$0x1]  }
   0x6   :  { %13 = vrot.lane.b32.xlu0 %v104_v2, %s135_s16  ;;  %25 = vrot.lane.b32.xlu1 %v106_v3, %s136_s17  ;;  %s141_s7 = smov 56   ;;  %s142_s8 = smov 48   ;;  %v113_v11 = vld [vmem:[%s209_s0 + $0x5] sm:$0x1]   ;;  %v114_v12 = vld [vmem:[%s209_s0 + $0x4] sm:$0x1]  }
   0x7   :  { %s143_s13 = smov 40   ;;  %s144_s14 = smov 32   ;;  %v115_v13 = vld [vmem:[%s209_s0 + $0x3] sm:$0x1]   ;;  %v116_v14 = vld [vmem:[%s209_s0 + $0x2] sm:$0x1]  }
   0x8   :  { %s145_s19 = smov 24   ;;  %s146_s20 = smov 16   ;;  %v117_v15 = vld [vmem:[%s209_s0 + $0x1] sm:$0x1]   ;;  %vm27_vm4 = vcmask 851712   ;;  %vm33_vm5 = vcmask 786112  }
   0x9   :  { %s147_s0 = smov 8   ;;  %vm39_vm6 = vcmask 720512   ;;  %vm45_vm7 = vcmask 654912   ;;  %vm51_vm8 = vcmask 589312   ;;  %vm57_vm9 = vcmask 523712  }
   0xa   :  { %31 = vrot.lane.b32.xlu0 %v107_v4, %s137_s24  ;;  %37 = vrot.lane.b32.xlu1 %v108_v5, %s138_s25  ;;  %vm63_vm10 = vcmask 458112   ;;  %vm69_vm11 = vcmask 392512   ;;  %vm75_vm12 = vcmask 326912   ;;  %vm81_vm13 = vcmask 261312  }
   0xb   :  { %vm87_vm14 = vcmask 195712   ;;  %vm93_vm15 = vcmask 130112  }
   0xe   :  { %43 = vrot.lane.b32.xlu0 %v109_v7, %s139_s30  ;;  %49 = vrot.lane.b32.xlu1 %v110_v8, %s140_s2 }
  0x12   :  { %55 = vrot.lane.b32.xlu0 %v111_v9, %s141_s7  ;;  %61 = vrot.lane.b32.xlu1 %v112_v10, %s142_s8 }
  0x16   :  { %67 = vrot.lane.b32.xlu0 %v113_v11, %s143_s13  ;;  %73 = vrot.lane.b32.xlu1 %v114_v12, %s144_s14 }
  0x1a   :  { %79 = vrot.lane.b32.xlu0 %v115_v13, %s145_s19  ;;  %85 = vrot.lane.b32.xlu1 %v116_v14, %s146_s20 }
  0x1e   :  { %91 = vrot.lane.b32.xlu0 %v117_v15, %s147_s0 }
  0x74   :  { %v8_v16 = vpop.permute.xlu0 %7   ;;  %v20_v17 = vpop.permute.xlu1 %19  }
  0x75   :  { %10 = vst.msk [vmem:[#allocation0] sm:$0x1] %vm9_vm1, %v8_v16  }
  0x78   :  { %v14_v18 = vpop.permute.xlu0 %13   ;;  %v26_v19 = vpop.permute.xlu1 %25  }
  0x79   :  { %16 = vst.msk [vmem:[#allocation0] sm:$0x1] %vm15_vm2, %v14_v18  }
  0x7a   :  { %22 = vst.msk [vmem:[#allocation0] sm:$0x1] %vm21_vm3, %v20_v17  }
  0x7b   :  { %28 = vst.msk [vmem:[#allocation0] sm:$0x1] %vm27_vm4, %v26_v19  }
  0x7c   :  { %v32_v20 = vpop.permute.xlu0 %31   ;;  %v38_v21 = vpop.permute.xlu1 %37  }
  0x7d   :  { %34 = vst.msk [vmem:[#allocation0] sm:$0x1] %vm33_vm5, %v32_v20  }
  0x7e   :  { %40 = vst.msk [vmem:[#allocation0] sm:$0x1] %vm39_vm6, %v38_v21  }
  0x80   :  { %v44_v22 = vpop.permute.xlu0 %43   ;;  %v50_v23 = vpop.permute.xlu1 %49  }
  0x81   :  { %46 = vst.msk [vmem:[#allocation0] sm:$0x1] %vm45_vm7, %v44_v22  }
  0x82   :  { %52 = vst.msk [vmem:[#allocation0] sm:$0x1] %vm51_vm8, %v50_v23  }
  0x84   :  { %v56_v24 = vpop.permute.xlu0 %55   ;;  %v62_v25 = vpop.permute.xlu1 %61  }
  0x85   :  { %58 = vst.msk [vmem:[#allocation0] sm:$0x1] %vm57_vm9, %v56_v24  }
  0x86   :  { %64 = vst.msk [vmem:[#allocation0] sm:$0x1] %vm63_vm10, %v62_v25  }
  0x88   :  { %v68_v26 = vpop.permute.xlu0 %67   ;;  %v74_v27 = vpop.permute.xlu1 %73  }
  0x89   :  { %70 = vst.msk [vmem:[#allocation0] sm:$0x1] %vm69_vm11, %v68_v26  }
  0x8a   :  { %76 = vst.msk [vmem:[#allocation0] sm:$0x1] %vm75_vm12, %v74_v27  }
  0x8c   :  { %v80_v28 = vpop.permute.xlu0 %79   ;;  %v86_v29 = vpop.permute.xlu1 %85  }
  0x8d   :  { %82 = vst.msk [vmem:[#allocation0] sm:$0x1] %vm81_vm13, %v80_v28  }
  0x8e   :  { %88 = vst.msk [vmem:[#allocation0] sm:$0x1] %vm87_vm14, %v86_v29  }
  0x90   :  { %v92_v30 = vpop.permute.xlu0 %91  }
  0x91   :  { %94 = vst.msk [vmem:[#allocation0] sm:$0x1] %vm93_vm15, %v92_v30  }
  0x98   :  { %v99_v31 = vld [vmem:[#allocation0] sm:$0x1] }
  0x99   :  { %102 = vst [vmem:[%s210_s1] sm:$0x1] %v99_v31 }

// kernel: flexible_double_conv.5
= control target key start
LH: loop header
LB: loop body
LE: loop exit
PB: predicated region body
PF: predicated region fallthrough
CT: control target
= control target key end

     0   :  { %s104_s0 = inlined_call_operand.vmem [shape: f32[32,128], index: 0, kind: input, shape index: {}]   ;;  %s105_s1 = inlined_call_operand.vmem [shape: f32[1,128], index: 1, kind: input, shape index: {}]   ;;  %s106_s2 = inlined_call_operand.vmem [shape: f32[1,128], index: 2, kind: input, shape index: {}]   ;;  %s107_s3 = inlined_call_operand.vmem [shape: f32[32,128], index: 3, kind: output, shape index: {}]  }
   0x1   :  { %v14_v0 = vld [vmem:[%s104_s0] sm:$0xff]  ;;  %v15_v4 = vld [vmem:[%s104_s0 + $0x8] sm:$0xff]  ;;  %v16_v5 = vld [vmem:[%s104_s0 + $0x10] sm:$0xff] }
   0x2   :  { %v52_v1 = vld [vmem:[%s105_s1] ss:$0 sm:$0xff]  ;;  %v17_v6 = vld [vmem:[%s104_s0 + $0x18] sm:$0xff] }
   0x3   :  { %v53_v2 = vld [vmem:[%s106_s2] ss:$0 sm:$0xff]  ;;  %v25_v3 = vmul.f32 %v52_v1, %v14_v0  ;;  %v26_v7 = vmul.f32 %v52_v1, %v15_v4  ;;  %v27_v8 = vmul.f32 %v52_v1, %v16_v5  ;;  %v28_v9 = vmul.f32 %v52_v1, %v17_v6 }
   0x5   :  { %v36_v10 = vadd.f32 %v53_v2, %v25_v3  ;;  %v37_v11 = vadd.f32 %v53_v2, %v26_v7  ;;  %v38_v12 = vadd.f32 %v53_v2, %v27_v8  ;;  %v39_v13 = vadd.f32 %v53_v2, %v28_v9 }
   0x7   :  { %v40_v14 = vmax.f32 %v36_v10, 0.0  ;;  %v41_v15 = vmax.f32 %v37_v11, 0.0  ;;  %v42_v16 = vmax.f32 %v38_v12, 0.0  ;;  %v43_v17 = vmax.f32 %v39_v13, 0.0 }
   0x9   :  { %44 = vst [vmem:[%s107_s3] sm:$0xff] %v40_v14  ;;  %45 = vst [vmem:[%s107_s3 + $0x8] sm:$0xff] %v41_v15 }
   0xa   :  { %46 = vst [vmem:[%s107_s3 + $0x10] sm:$0xff] %v42_v16  ;;  %47 = vst [vmem:[%s107_s3 + $0x18] sm:$0xff] %v43_v17 }

// kernel: flexible_double_conv.4
= control target key start
LH: loop header
LB: loop body
LE: loop exit
PB: predicated region body
PF: predicated region fallthrough
CT: control target
= control target key end

     0   :  { %s1634_s15 = smov 0   ;;  %s1636_s16 = smov 0   ;;  %s2327_s0 = inlined_call_operand.vmem [shape: f32[2,2,10,18,4], index: 0, kind: input, shape index: {}]   ;;  %s2328_s1 = inlined_call_operand.vmem [shape: f32[36,8], index: 1, kind: input, shape index: {}]   ;;  %s2329_s2 = inlined_call_operand.vmem [shape: f32[4,128,8], index: 2, kind: output, shape index: {0}]   ;;  %s2330_s3 = inlined_call_operand.vmem [shape: f32[4,1,8], index: 3, kind: output, shape index: {1}]   ;;  %s2331_s4 = inlined_call_operand.vmem [shape: f32[4,1,8], index: 4, kind: output, shape index: {2}]  }
   0x1   :  { %s1638_s17 = smov 0   ;;  %s1640_s18 = smov 0  }
   0x2   :  { %s1642_s19 = smov 0  }
   0x3 LB: > { %s24_s20 = sadd.s32 1, %s1591_s17  ;;  %s27_s21 = sadd.s32 1, %s1595_s18  ;;  %s1599_s19 = sphi %s1642_s19, %s15_s19   ;;  %s1595_s18 = sphi %s1640_s18, %s2335_s18   ;;  %s1591_s17 = sphi %s1638_s17, %s2334_s17   ;;  %s1587_s16 = sphi %s1636_s16, %s2333_s16   ;;  %s1583_s15 = sphi %s1634_s15, %s2332_s15  }
   0x4   : > { %p25_p0 = scmp.ge.s32.totalorder %s24_s20, 2  ;;  %p1419_p1 = scmp.ge.s32.totalorder %s1599_s19, 1 }
   0x5   : > { %p197_p2 = scmp.lt.s32.totalorder %s1599_s19, 5 }
   0x6   : > { %s2337_s20 = smov (%p25_p0, %s24_s20), 0  ;;  %s2339_s21 = smov (!%p25_p0, %s27_s21), %s1595_s18 }
   0x7   : > { %p198_p3 = pnand %p1419_p1, %p197_p2  ;;  %p29_p4 = scmp.ge.s32.totalorder %s2339_s21, 2 }
   0x8   : > { %p239_p5 = scmp.lt.s32.totalorder (!%p198_p3), %s1587_s16, 1  ;;  %p241_p6 = scmp.lt.s32.totalorder (!%p198_p3), %s1583_s15, 1 }
   0x9   : > { %s2341_s21 = smov (%p29_p4, %s2339_s21), 0  ;;  %201 = sbr.rel (%p198_p3) target bundleno = 607 (0x25f), region = 28 }
   0xa   : > { %s1601_s5 = smov (!%p198_p3), 12   ;;  %s1602_s6 = smov (!%p198_p3), 8  }
   0xb   : > { %s1603_s7 = smov (!%p198_p3), 4   ;;  %s1604_s8 = smov (!%p198_p3), 16  }
   0xc   : > { %s1605_s9 = smov (!%p198_p3), 20   ;;  %s1606_s10 = smov (!%p198_p3), 24  }
   0xd   : > { %s1608_s29 = smov (!%p198_p3), 32  }
   0xe   : > { %s240_s22 = scalar_select %p239_p5, %s1587_s16, 1  ;;  %vm414_vm0 = vcmask 1045504   ;;  %vm325_vm1 = vcmask 1046528   ;;  %v957_v28 = vld [vmem:[%s2328_s1 + $0x20] sm:$0xf]  ;;  %vm1007_vm2 = vcmask 1043456  }
   0xf   : > { %s242_s23 = scalar_select %p241_p6, %s1583_s15, 1  ;;  %1467 = vmatprep.subr.msk.mxu0 %vm1007_vm2, %v957_v28  ;;  %1501 = vmatprep.subr.msk.mxu1 %vm1007_vm2, %v957_v28  ;;  %v956_v31 = vld [vmem:[%s2328_s1 + $0x18] sm:$0xff]  ;;  %v955_v33 = vld [vmem:[%s2328_s1 + $0x10] sm:$0xff]  ;;  %v954_v35 = vld [vmem:[%s2328_s1 + $0x8] sm:$0xff]  ;;  %vm817_vm3 = vcmask 31744   ;;  %vm834_vm4 = vcmask 64512  }
  0x10   : > { %s1512_s24 = smul.u32 60, %s240_s22  ;;  %1468 = vmatpush3.msk.msra.mxu0 %vm1007_vm2, %v957_v28  ;;  %1506 = vmatpush3.msk.msra.mxu1 %vm1007_vm2, %v957_v28  ;;  %v953_v39 = vld [vmem:[%s2328_s1] sm:$0xff]  ;;  %vm851_vm5 = vcmask 97280   ;;  %vm868_vm6 = vcmask 130048   ;;  %vm885_vm7 = vcmask 162816   ;;  %vm902_vm8 = vcmask 195584  }
  0x11   : > { %s1511_s25 = smul.u32 30, %s242_s23  ;;  %1469 = vmatprep.subr.mxu0 %v956_v31  ;;  %1502 = vmatprep.subr.mxu1 %v956_v31  ;;  %vm919_vm9 = vcmask 228352   ;;  %vm936_vm10 = vcmask 261120   ;;  %vm958_vm11 = vcmask 293888   ;;  %vm1209_vm12 = vcmask 57344  }
  0x12   : > { %1470 = vmatpush3.msra.mxu0 %v956_v31  ;;  %1507 = vmatpush3.msra.mxu1 %v956_v31 }
  0x13   : > { %s245_s26 = sadd.s32 %s1512_s24, %s1511_s25  ;;  %1471 = vmatprep.subr.mxu0 %v955_v33  ;;  %1503 = vmatprep.subr.mxu1 %v955_v33 }
  0x14   : > { %s1420_s27 = sshll.u32 %s245_s26, 3  ;;  %s1607_s26 = smov 28   ;;  %1472 = vmatpush3.msra.mxu0 %v955_v33  ;;  %1508 = vmatpush3.msra.mxu1 %v955_v33 }
  0x15   : > { %s1675_s30 = scalar_lea.vmem %s2327_s0, %s1420_s27  ;;  %1473 = vmatprep.subr.mxu0 %v954_v35  ;;  %1504 = vmatprep.subr.mxu1 %v954_v35 }
  0x16   : > { %v1678_v0 = vld [vmem:[%s1675_s30 + $0x20] sm:$0xff]  ;;  %v1681_v1 = vld [vmem:[%s1675_s30 + $0x18] sm:$0xff]  ;;  %v1691_v3 = vld [vmem:[%s1675_s30 + $0x8] sm:$0xff]  ;;  %1474 = vmatpush3.msra.mxu0 %v954_v35  ;;  %1509 = vmatpush3.msra.mxu1 %v954_v35 }
  0x17   : > { %v1684_v2 = vld [vmem:[%s1675_s30] sm:$0xff]  ;;  %507 = vrot.lane.b32.xlu1 %v1678_v0, %s1601_s5  ;;  %505 = vrot.lane.b32.xlu0 %v1681_v1, %s1601_s5  ;;  %v273_v6 = vld [vmem:[%s1675_s30 + $0x10] sm:$0x3]  ;;  %v416_v7 = vrot.slane %v1691_v3, 2  ;;  %v327_v8 = vrot.slane %v1691_v3, 1  ;;  %v331_v15 = vrot.slane %v1681_v1, 1 }
  0x18   : > { %v415_v4 = vrot.slane %v1684_v2, 2  ;;  %v326_v5 = vrot.slane %v1684_v2, 1  ;;  %v418_v9 = vrot.slane %v273_v6, 2  ;;  %v329_v10 = vrot.slane %v273_v6, 1  ;;  %v276_v17 = vld [vmem:[%s1675_s30 + $0x28] sm:$0x3]  ;;  %1475 = vmatprep.subr.mxu0 %v953_v39  ;;  %1505 = vmatprep.subr.mxu1 %v953_v39 }
  0x19   : > { %v332_v16 = vrot.slane %v1678_v0, 1  ;;  %v420_v19 = vrot.slane %v1681_v1, 2  ;;  %v421_v20 = vrot.slane %v1678_v0, 2  ;;  %v334_v21 = vrot.slane %v276_v17, 1  ;;  %v1721_v25 = vld [vmem:[%s1675_s30 + $0x30] sm:$0xff]  ;;  %v1725_v27 = vld [vmem:[%s1675_s30 + $0x38] sm:$0xff]  ;;  %1476 = vmatpush3.msra.mxu0 %v953_v39  ;;  %1510 = vmatpush3.msra.mxu1 %v953_v39 }
  0x1a   : > { %v417_v11 = vsel %vm414_vm0, %v415_v4, %v416_v7  ;;  %v328_v12 = vsel %vm325_vm1, %v326_v5, %v327_v8  ;;  %v419_v13 = vsel %vm414_vm0, %v416_v7, %v418_v9  ;;  %v330_v14 = vsel %vm325_vm1, %v327_v8, %v329_v10  ;;  %v279_v34 = vld [vmem:[%s1675_s30 + $0x40] sm:$0x3]  ;;  %v1772_v44 = vld [vmem:[%s1675_s30 + $0x48] sm:$0xff]  ;;  %v1775_v45 = vld [vmem:[%s1675_s30 + $0x50] sm:$0xff] }
  0x1b   : > { %455 = vrot.lane.b32.xlu1 %v417_v11, %s1602_s6  ;;  %366 = vrot.lane.b32.xlu0 %v328_v12, %s1603_s7  ;;  %v333_v18 = vsel %vm325_vm1, %v331_v15, %v332_v16  ;;  %v422_v22 = vsel %vm414_vm0, %v420_v19, %v421_v20  ;;  %v335_v23 = vsel %vm325_vm1, %v332_v16, %v334_v21  ;;  %v423_v24 = vrot.slane %v276_v17, 2  ;;  %v282_v49 = vld [vmem:[%s1675_s30 + $0x58] sm:$0x3]  ;;  %v1807_v57 = vld [vmem:[%s1675_s30 + $0x60] sm:$0xff] }
  0x1c   : > { %v336_v29 = vrot.slane %v1721_v25, 1  ;;  %v337_v30 = vrot.slane %v1725_v27, 1  ;;  %v425_v36 = vrot.slane %v1721_v25, 2  ;;  %v426_v37 = vrot.slane %v1725_v27, 2  ;;  %v1810_v58 = vld [vmem:[%s1675_s30 + $0x68] sm:$0xff]  ;;  %v1844_v12 = vld [vmem:[%s1675_s30 + $0x78] sm:$0xff] }
  0x1d   : > { %v424_v26 = vsel %vm414_vm0, %v421_v20, %v423_v24  ;;  %v339_v38 = vrot.slane %v279_v34, 1  ;;  %v428_v42 = vrot.slane %v279_v34, 2  ;;  %v341_v46 = vrot.slane %v1772_v44, 1  ;;  %v285_v62 = vld [vmem:[%s1675_s30 + $0x70] sm:$0x3]  ;;  %v1847_v15 = vld [vmem:[%s1675_s30 + $0x80] sm:$0xff] }
  0x1e   : > { %v338_v32 = vsel %vm325_vm1, %v336_v29, %v337_v30  ;;  %v427_v40 = vsel %vm414_vm0, %v425_v36, %v426_v37  ;;  %v342_v47 = vrot.slane %v1775_v45, 1  ;;  %v430_v50 = vrot.slane %v1772_v44, 2 }
  0x1f   : > { %457 = vrot.lane.b32.xlu1 %v419_v13, %s1602_s6  ;;  %368 = vrot.lane.b32.xlu0 %v330_v14, %s1603_s7  ;;  %v340_v41 = vsel %vm325_vm1, %v337_v30, %v339_v38  ;;  %v429_v43 = vsel %vm414_vm0, %v426_v37, %v428_v42  ;;  %v431_v51 = vrot.slane %v1775_v45, 2  ;;  %v344_v52 = vrot.slane %v282_v49, 1 }
  0x20   : > { %v343_v48 = vsel %vm325_vm1, %v341_v46, %v342_v47  ;;  %v433_v55 = vrot.slane %v282_v49, 2  ;;  %v346_v59 = vrot.slane %v1807_v57, 1  ;;  %v347_v60 = vrot.slane %v1810_v58, 1 }
  0x21   : > { %v432_v53 = vsel %vm414_vm0, %v430_v50, %v431_v51  ;;  %v345_v54 = vsel %vm325_vm1, %v342_v47, %v344_v52  ;;  %v435_v63 = vrot.slane %v1807_v57, 2  ;;  %v436_v4 = vrot.slane %v1810_v58, 2  ;;  %v1894_v47 = vld [vmem:[%s1675_s30 + $0x90] sm:$0xff]  ;;  %v1902_v50 = vld [vmem:[%s1675_s30 + $0x98] sm:$0xff] }
  0x22   : > { %v434_v56 = vsel %vm414_vm0, %v431_v51, %v433_v55  ;;  %v348_v61 = vsel %vm325_vm1, %v346_v59, %v347_v60  ;;  %v349_v5 = vrot.slane %v285_v62, 1  ;;  %v438_v8 = vrot.slane %v285_v62, 2 }
  0x23   : > { %370 = vrot.lane.b32.xlu1 %v333_v18, %s1603_s7  ;;  %559 = vrot.lane.b32.xlu0 %v333_v18, %s1604_s8  ;;  %v437_v6 = vsel %vm414_vm0, %v435_v63, %v436_v4  ;;  %v351_v16 = vrot.slane %v1844_v12, 1  ;;  %v352_v17 = vrot.slane %v1847_v15, 1  ;;  %v440_v24 = vrot.slane %v1844_v12, 2 }
  0x24   : > { %v350_v7 = vsel %vm325_vm1, %v347_v60, %v349_v5  ;;  %v439_v9 = vsel %vm414_vm0, %v436_v4, %v438_v8  ;;  %v356_v55 = vrot.slane %v1894_v47, 1 }
  0x25   : > { %v353_v20 = vsel %vm325_vm1, %v351_v16, %v352_v17 }
  0x27   : > { %612 = vrot.lane.b32.xlu1 %v422_v22, %s1605_s9  ;;  %561 = vrot.lane.b32.xlu0 %v335_v23, %s1604_s8 }
  0x2b   : > { %459 = vrot.lane.b32.xlu1 %v422_v22, %s1602_s6  ;;  %372 = vrot.lane.b32.xlu0 %v335_v23, %s1603_s7  ;;  %v288_v23 = vld [vmem:[%s1675_s30 + $0x88] sm:$0x3] }
  0x2c   : > { %v354_v28 = vrot.slane %v288_v23, 1  ;;  %v443_v35 = vrot.slane %v288_v23, 2 }
  0x2f   : > { %662 = vrot.lane.b32.xlu1 %v1721_v25, %s1606_s10  ;;  %614 = vrot.lane.b32.xlu0 %v424_v26, %s1605_s9 }
  0x33   : > { %509 = vrot.lane.b32.xlu1 %v1721_v25, %s1601_s5  ;;  %461 = vrot.lane.b32.xlu0 %v424_v26, %s1602_s6  ;;  %v441_v26 = vrot.slane %v1847_v15, 2 }
  0x35   : > { %v442_v31 = vsel %vm414_vm0, %v440_v24, %v441_v26  ;;  %v444_v38 = vsel %vm414_vm0, %v441_v26, %v443_v35 }
  0x37   : > { %716 = vrot.lane.b32.xlu1 %v338_v32, %s1607_s26  ;;  %664 = vrot.lane.b32.xlu0 %v1725_v27, %s1606_s10 }
  0x3b   : > { %563 = vrot.lane.b32.xlu1 %v338_v32, %s1604_s8  ;;  %511 = vrot.lane.b32.xlu0 %v1725_v27, %s1601_s5 }
  0x3f   : > { %769 = vrot.lane.b32.xlu1 %v427_v40, %s1608_s29  ;;  %718 = vrot.lane.b32.xlu0 %v340_v41, %s1607_s26 }
  0x43   : > { %565 = vrot.lane.b32.xlu1 %v340_v41, %s1604_s8  ;;  %374 = vrot.lane.b32.xlu0 %v338_v32, %s1603_s7  ;;  %v355_v32 = vsel %vm325_vm1, %v352_v17, %v354_v28 }
  0x47   : > { %771 = vrot.lane.b32.xlu1 %v429_v43, %s1608_s29  ;;  %616 = vrot.lane.b32.xlu0 %v427_v40, %s1605_s9 }
  0x4b   : > { %463 = vrot.lane.b32.xlu1 %v427_v40, %s1602_s6  ;;  %376 = vrot.lane.b32.xlu0 %v340_v41, %s1603_s7 }
  0x4f   : > { %666 = vrot.lane.b32.xlu1 %v1772_v44, %s1606_s10  ;;  %618 = vrot.lane.b32.xlu0 %v429_v43, %s1605_s9 }
  0x53   : > { %513 = vrot.lane.b32.xlu1 %v1772_v44, %s1601_s5  ;;  %465 = vrot.lane.b32.xlu0 %v429_v43, %s1602_s6 }
  0x57   : > { %720 = vrot.lane.b32.xlu1 %v343_v48, %s1607_s26  ;;  %668 = vrot.lane.b32.xlu0 %v1775_v45, %s1606_s10 }
  0x5b   : > { %567 = vrot.lane.b32.xlu1 %v343_v48, %s1604_s8  ;;  %515 = vrot.lane.b32.xlu0 %v1775_v45, %s1601_s5 }
  0x5f   : > { %773 = vrot.lane.b32.xlu1 %v432_v53, %s1608_s29  ;;  %722 = vrot.lane.b32.xlu0 %v345_v54, %s1607_s26 }
  0x63   : > { %569 = vrot.lane.b32.xlu1 %v345_v54, %s1604_s8  ;;  %378 = vrot.lane.b32.xlu0 %v343_v48, %s1603_s7 }
  0x67   : > { %775 = vrot.lane.b32.xlu1 %v434_v56, %s1608_s29  ;;  %620 = vrot.lane.b32.xlu0 %v432_v53, %s1605_s9 }
  0x6b   : > { %467 = vrot.lane.b32.xlu1 %v432_v53, %s1602_s6  ;;  %380 = vrot.lane.b32.xlu0 %v345_v54, %s1603_s7 }
  0x6f   : > { %670 = vrot.lane.b32.xlu1 %v1807_v57, %s1606_s10  ;;  %622 = vrot.lane.b32.xlu0 %v434_v56, %s1605_s9 }
  0x73   : > { %517 = vrot.lane.b32.xlu1 %v1807_v57, %s1601_s5  ;;  %469 = vrot.lane.b32.xlu0 %v434_v56, %s1602_s6  ;;  %v357_v56 = vrot.slane %v1902_v50, 1 }
  0x75   : > { %v358_v63 = vsel %vm325_vm1, %v356_v55, %v357_v56 }
  0x77   : > { %724 = vrot.lane.b32.xlu1 %v348_v61, %s1607_s26  ;;  %672 = vrot.lane.b32.xlu0 %v1810_v58, %s1606_s10 }
  0x7b   : > { %571 = vrot.lane.b32.xlu1 %v348_v61, %s1604_s8  ;;  %519 = vrot.lane.b32.xlu0 %v1810_v58, %s1601_s5 }
  0x7f   : > { %777 = vrot.lane.b32.xlu1 %v437_v6, %s1608_s29  ;;  %726 = vrot.lane.b32.xlu0 %v350_v7, %s1607_s26 }
  0x83   : > { %573 = vrot.lane.b32.xlu1 %v350_v7, %s1604_s8  ;;  %382 = vrot.lane.b32.xlu0 %v348_v61, %s1603_s7 }
  0x87   : > { %779 = vrot.lane.b32.xlu1 %v439_v9, %s1608_s29  ;;  %624 = vrot.lane.b32.xlu0 %v437_v6, %s1605_s9 }
  0x89   : > { %v1839_v10 = vpop.permute.xlu1 %507  ;;  %v506_v11 = vpop.permute.xlu0 %505 }
  0x8b   : > { %471 = vrot.lane.b32.xlu1 %v437_v6, %s1602_s6  ;;  %384 = vrot.lane.b32.xlu0 %v350_v7, %s1603_s7  ;;  %v291_v7 = vld [vmem:[%s1675_s30 + $0xa0] sm:$0x3] }
  0x8c   : > { %v448_v26 = vrot.slane %v291_v7, 2 }
  0x8d   : > { %v456_v13 = vpop.permute.xlu1 %455  ;;  %v367_v14 = vpop.permute.xlu0 %366 }
  0x8e   : > { %v818_v41 = vsel %vm817_vm3, %v1684_v2, %v367_v14  ;;  %v359_v14 = vrot.slane %v291_v7, 1 }
  0x8f   : > { %674 = vrot.lane.b32.xlu1 %v1844_v12, %s1606_s10  ;;  %626 = vrot.lane.b32.xlu0 %v439_v9, %s1605_s9  ;;  %v835_v46 = vsel %vm834_vm4, %v818_v41, %v456_v13  ;;  %v445_v13 = vrot.slane %v1894_v47, 2  ;;  %v1969_v41 = vld [vmem:[%s1675_s30 + $0xa8] sm:$0xff] }
  0x90   : > { %v852_v2 = vsel %vm851_vm5, %v835_v46, %v506_v11 }
  0x91   : > { %v1854_v18 = vpop.permute.xlu1 %457  ;;  %v369_v19 = vpop.permute.xlu0 %368 }
  0x92   : > { %v819_v52 = vsel %vm817_vm3, %v1691_v3, %v369_v19 }
  0x93   : > { %521 = vrot.lane.b32.xlu1 %v1844_v12, %s1601_s5  ;;  %473 = vrot.lane.b32.xlu0 %v439_v9, %s1602_s6  ;;  %v836_v3 = vsel %vm834_vm4, %v819_v52, %v1854_v18 }
  0x94   : > { %v853_v4 = vsel %vm851_vm5, %v836_v3, %v1839_v10  ;;  %v446_v10 = vrot.slane %v1902_v50, 2 }
  0x95   : > { %v1860_v21 = vpop.permute.xlu1 %370  ;;  %v560_v22 = vpop.permute.xlu0 %559 }
  0x96   : > { %v869_v51 = vsel %vm868_vm6, %v852_v2, %v560_v22  ;;  %v360_v22 = vsel %vm325_vm1, %v357_v56, %v359_v14  ;;  %v1978_v2 = vld [vmem:[%s1675_s30 + $0xb0] sm:$0xff] }
  0x97   : > { %728 = vrot.lane.b32.xlu1 %v353_v20, %s1607_s26  ;;  %676 = vrot.lane.b32.xlu0 %v1847_v15, %s1606_s10 }
  0x99   : > { %v613_v29 = vpop.permute.xlu1 %612  ;;  %v562_v30 = vpop.permute.xlu0 %561 }
  0x9a   : > { %v886_v53 = vsel %vm885_vm7, %v869_v51, %v613_v29  ;;  %v870_v8 = vsel %vm868_vm6, %v853_v4, %v562_v30  ;;  %v449_v30 = vsel %vm414_vm0, %v446_v10, %v448_v26  ;;  %v362_v51 = vrot.slane %v1978_v2, 1 }
  0x9b   : > { %575 = vrot.lane.b32.xlu1 %v353_v20, %s1604_s8  ;;  %523 = vrot.lane.b32.xlu0 %v1847_v15, %s1601_s5 }
  0x9d   : > { %v1873_v33 = vpop.permute.xlu1 %459  ;;  %v1875_v34 = vpop.permute.xlu0 %372 }
  0x9e   : > { %v821_v55 = vsel %vm817_vm3, %v1678_v0, %v1875_v34  ;;  %v294_v0 = vld [vmem:[%s1675_s30 + $0xb8] sm:$0x3] }
  0x9f   : > { %781 = vrot.lane.b32.xlu1 %v442_v31, %s1608_s29  ;;  %730 = vrot.lane.b32.xlu0 %v355_v32, %s1607_s26  ;;  %v364_v4 = vrot.slane %v294_v0, 1 }
  0xa1   : > { %v663_v36 = vpop.permute.xlu1 %662  ;;  %v615_v37 = vpop.permute.xlu0 %614 }
  0xa2   : > { %v903_v54 = vsel %vm902_vm8, %v886_v53, %v663_v36  ;;  %v887_v9 = vsel %vm885_vm7, %v870_v8, %v615_v37  ;;  %v820_v37 = vsel %vm817_vm3, %v1681_v1, %v1860_v21 }
  0xa3   : > { %577 = vrot.lane.b32.xlu1 %v355_v32, %s1604_s8  ;;  %386 = vrot.lane.b32.xlu0 %v353_v20, %s1603_s7  ;;  %v447_v20 = vsel %vm414_vm0, %v445_v13, %v446_v10  ;;  %v365_v13 = vsel %vm325_vm1, %v362_v51, %v364_v4 }
  0xa5   : > { %v1882_v39 = vpop.permute.xlu1 %509  ;;  %v1884_v40 = vpop.permute.xlu0 %461 }
  0xa6   : > { %v838_v56 = vsel %vm834_vm4, %v821_v55, %v1884_v40 }
  0xa7   : > { %783 = vrot.lane.b32.xlu1 %v444_v38, %s1608_s29  ;;  %628 = vrot.lane.b32.xlu0 %v442_v31, %s1605_s9 }
  0xa9   : > { %v717_v42 = vpop.permute.xlu1 %716  ;;  %v665_v43 = vpop.permute.xlu0 %664 }
  0xaa   : > { %v920_v59 = vsel %vm919_vm9, %v903_v54, %v717_v42  ;;  %v904_v11 = vsel %vm902_vm8, %v887_v9, %v665_v43 }
  0xab   : > { %475 = vrot.lane.b32.xlu1 %v442_v31, %s1602_s6  ;;  %388 = vrot.lane.b32.xlu0 %v355_v32, %s1603_s7 }
  0xad   : > { %v1897_v48 = vpop.permute.xlu1 %563  ;;  %v1899_v49 = vpop.permute.xlu0 %511 }
  0xaf   : > { %678 = vrot.lane.b32.xlu1 %v1894_v47, %s1606_s10  ;;  %630 = vrot.lane.b32.xlu0 %v444_v38, %s1605_s9 }
  0xb1   : > { %v770_v60 = vpop.permute.xlu1 %769  ;;  %v719_v61 = vpop.permute.xlu0 %718 }
  0xb2   : > { %v937_v62 = vsel %vm936_vm10, %v920_v59, %v770_v60  ;;  %v921_v16 = vsel %vm919_vm9, %v904_v11, %v719_v61  ;;  %v855_v60 = vsel %vm851_vm5, %v838_v56, %v1899_v49  ;;  %v451_v49 = vrot.slane %v1978_v2, 2  ;;  %v297_v56 = vld [vmem:[%s1675_s30 + $0xd0] sm:$0x3] }
  0xb3   : > { %525 = vrot.lane.b32.xlu1 %v1894_v47, %s1601_s5  ;;  %477 = vrot.lane.b32.xlu0 %v444_v38, %s1602_s6  ;;  %v837_v38 = vsel %vm834_vm4, %v820_v37, %v1873_v33 }
  0xb4   : > { %1477 = vmatprep.mubr.msk.f32.mxu0 %vm958_vm11, %v937_v62  ;;  %v854_v42 = vsel %vm851_vm5, %v837_v38, %v1882_v39  ;;  %v361_v39 = vrot.slane %v1969_v41, 1 }
  0xb5   : > { %v1925_v5 = vpop.permute.xlu1 %565  ;;  %v1927_v6 = vpop.permute.xlu0 %374  ;;  %v871_v1 = vsel %vm868_vm6, %v854_v42, %v1897_v48  ;;  %v296_v42 = vld [vmem:[%s1675_s30 + $0xc8] sm:$0xff] }
  0xb6   : > { %v363_v59 = vsel %vm325_vm1, %v361_v39, %v362_v51  ;;  %v872_v34 = vsel %vm868_vm6, %v855_v60, %v1925_v5  ;;  %v608_v60 = vrot.slane %v296_v42, 2 }
  0xb7   : > { %732 = vrot.lane.b32.xlu1 %v358_v63, %s1607_s26  ;;  %680 = vrot.lane.b32.xlu0 %v1902_v50, %s1606_s10 }
  0xb9   : > { %v772_v17 = vpop.permute.xlu1 %771  ;;  %v617_v18 = vpop.permute.xlu0 %616 }
  0xba   : > { %v938_v19 = vsel %vm936_vm10, %v921_v16, %v772_v17  ;;  %v888_v21 = vsel %vm885_vm7, %v871_v1, %v617_v18  ;;  %v453_v16 = vrot.slane %v294_v0, 2  ;;  %v557_v0 = vrot.slane %v297_v56, 1 }
  0xbb   : > { %579 = vrot.lane.b32.xlu1 %v358_v63, %s1604_s8  ;;  %527 = vrot.lane.b32.xlu0 %v1902_v50, %s1601_s5 }
  0xbc   : > { %1478 = vmatmul.mubr.msk.f32.vlgmr.msra.gmra.mxu0 %vm958_vm11, %v938_v19  ;;  %v454_v19 = vsel %vm414_vm0, %v451_v49, %v453_v16  ;;  %v299_v16 = vld [vmem:[%s1675_s30 + $0xe0] sm:$0xff] }
  0xbd   : > { %v1946_v23 = vpop.permute.xlu1 %463  ;;  %v1948_v24 = vpop.permute.xlu0 %376 }
  0xbf   : > { %785 = vrot.lane.b32.xlu1 %v447_v20, %s1608_s29  ;;  %734 = vrot.lane.b32.xlu0 %v360_v22, %s1607_s26 }
  0xc1   : > { %v667_v28 = vpop.permute.xlu1 %666  ;;  %v619_v29 = vpop.permute.xlu0 %618 }
  0xc2   : > { %v905_v33 = vsel %vm902_vm8, %v888_v21, %v667_v28  ;;  %v889_v62 = vsel %vm885_vm7, %v872_v34, %v619_v29  ;;  %v822_v29 = vsel %vm817_vm3, %v1721_v25, %v1927_v6  ;;  %v555_v21 = vrot.slane %v296_v42, 1 }
  0xc3   : > { %581 = vrot.lane.b32.xlu1 %v360_v22, %s1604_s8  ;;  %390 = vrot.lane.b32.xlu0 %v358_v63, %s1603_s7  ;;  %v450_v63 = vrot.slane %v1969_v41, 2 }
  0xc5   : > { %v1955_v31 = vpop.permute.xlu1 %513  ;;  %v1957_v32 = vpop.permute.xlu0 %465  ;;  %v452_v11 = vsel %vm414_vm0, %v450_v63, %v451_v49  ;;  %v558_v63 = vsel %vm325_vm1, %v555_v21, %v557_v0 }
  0xc7   : > { %787 = vrot.lane.b32.xlu1 %v449_v30, %s1608_s29  ;;  %632 = vrot.lane.b32.xlu0 %v447_v20, %s1605_s9 }
  0xc9   : > { %v721_v35 = vpop.permute.xlu1 %720  ;;  %v669_v36 = vpop.permute.xlu0 %668 }
  0xca   : > { %v922_v52 = vsel %vm919_vm9, %v905_v33, %v721_v35  ;;  %v906_v40 = vsel %vm902_vm8, %v889_v62, %v669_v36  ;;  %v295_v35 = vld [vmem:[%s1675_s30 + $0xc0] sm:$0xff] }
  0xcb   : > { %479 = vrot.lane.b32.xlu1 %v447_v20, %s1602_s6  ;;  %392 = vrot.lane.b32.xlu0 %v360_v22, %s1603_s7 }
  0xcd   : > { %v1973_v43 = vpop.permute.xlu1 %567  ;;  %v1975_v46 = vpop.permute.xlu0 %515 }
  0xcf   : > { %682 = vrot.lane.b32.xlu1 %v1969_v41, %s1606_s10  ;;  %634 = vrot.lane.b32.xlu0 %v449_v30, %s1605_s9 }
  0xd1   : > { %v774_v53 = vpop.permute.xlu1 %773  ;;  %v723_v54 = vpop.permute.xlu0 %722 }
  0xd2   : > { %v939_v48 = vsel %vm936_vm10, %v922_v52, %v774_v53  ;;  %v923_v7 = vsel %vm919_vm9, %v906_v40, %v723_v54 }
  0xd3   : > { %529 = vrot.lane.b32.xlu1 %v1969_v41, %s1601_s5  ;;  %481 = vrot.lane.b32.xlu0 %v449_v30, %s1602_s6  ;;  %v839_v30 = vsel %vm834_vm4, %v822_v29, %v1946_v23  ;;  %v554_v23 = vrot.slane %v295_v35, 1 }
  0xd4   : > { %1480 = vmatprep.mubr.msk.f32.mxu0 %vm958_vm11, %v939_v48  ;;  %v856_v36 = vsel %vm851_vm5, %v839_v30, %v1955_v31 }
  0xd5   : > { %v2003_v61 = vpop.permute.xlu1 %569  ;;  %v2005_v3 = vpop.permute.xlu0 %378  ;;  %v873_v1 = vsel %vm868_vm6, %v856_v36, %v1973_v43  ;;  %v823_v43 = vsel %vm817_vm3, %v1725_v27, %v1948_v24  ;;  %v556_v53 = vsel %vm325_vm1, %v554_v23, %v555_v21  ;;  %v765_v36 = vrot.slane %v299_v16, 2 }
  0xd6   : > { %v840_v52 = vsel %vm834_vm4, %v823_v43, %v1957_v32 }
  0xd7   : > { %736 = vrot.lane.b32.xlu1 %v363_v59, %s1607_s26  ;;  %684 = vrot.lane.b32.xlu0 %v1978_v2, %s1606_s10  ;;  %v857_v54 = vsel %vm851_vm5, %v840_v52, %v1975_v46 }
  0xd8   : > { %v874_v27 = vsel %vm868_vm6, %v857_v54, %v2003_v61 }
  0xd9   : > { %v776_v8 = vpop.permute.xlu1 %775  ;;  %v621_v9 = vpop.permute.xlu0 %620 }
  0xda   : > { %v940_v5 = vsel %vm936_vm10, %v923_v7, %v776_v8  ;;  %v890_v25 = vsel %vm885_vm7, %v873_v1, %v621_v9  ;;  %v610_v7 = vrot.slane %v297_v56, 2 }
  0xdb   : > { %583 = vrot.lane.b32.xlu1 %v363_v59, %s1604_s8  ;;  %531 = vrot.lane.b32.xlu0 %v1978_v2, %s1601_s5 }
  0xdc   : > { %1481 = vmatmul.mubr.msk.f32.gmra.mxu0 %vm958_vm11, %v940_v5  ;;  %v611_v5 = vsel %vm414_vm0, %v608_v60, %v610_v7 }
  0xdd   : > { %v2025_v10 = vpop.permute.xlu1 %467  ;;  %v2027_v14 = vpop.permute.xlu0 %380 }
  0xdf   : > { %789 = vrot.lane.b32.xlu1 %v452_v11, %s1608_s29  ;;  %738 = vrot.lane.b32.xlu0 %v365_v13, %s1607_s26 }
  0xe1   : > { %v671_v17 = vpop.permute.xlu1 %670  ;;  %v623_v18 = vpop.permute.xlu0 %622 }
  0xe2   : > { %v907_v6 = vsel %vm902_vm8, %v890_v25, %v671_v17  ;;  %v891_v24 = vsel %vm885_vm7, %v874_v27, %v623_v18  ;;  %v298_v17 = vld [vmem:[%s1675_s30 + $0xd8] sm:$0xff]  ;;  %v300_v18 = vld [vmem:[%s1675_s30 + $0xe8] sm:$0x3]  ;;  %s1421_s30 = sshll.u32 %s1587_s16, 1 }
  0xe3   : > { %585 = vrot.lane.b32.xlu1 %v365_v13, %s1604_s8  ;;  %394 = vrot.lane.b32.xlu0 %v363_v59, %s1603_s7  ;;  %v607_v59 = vrot.slane %v295_v35, 2  ;;  %v767_v23 = vrot.slane %v300_v18, 2 }
  0xe5   : > { %v2034_v20 = vpop.permute.xlu1 %517  ;;  %v2036_v22 = vpop.permute.xlu0 %469  ;;  %v609_v61 = vsel %vm414_vm0, %v607_v59, %v608_v60 }
  0xe7   : > { %791 = vrot.lane.b32.xlu1 %v454_v19, %s1608_s29  ;;  %636 = vrot.lane.b32.xlu0 %v452_v11, %s1605_s9 }
  0xe9   : > { %v725_v26 = vpop.permute.xlu1 %724  ;;  %v673_v28 = vpop.permute.xlu0 %672 }
  0xea   : > { %v924_v31 = vsel %vm919_vm9, %v907_v6, %v725_v26  ;;  %v908_v32 = vsel %vm902_vm8, %v891_v24, %v673_v28  ;;  %v711_v26 = vrot.slane %v298_v17, 1  ;;  %v714_v28 = vrot.slane %v300_v18, 1 }
  0xeb   : > { %483 = vrot.lane.b32.xlu1 %v452_v11, %s1602_s6  ;;  %396 = vrot.lane.b32.xlu0 %v365_v13, %s1603_s7 }
  0xed   : > { %v2050_v37 = vpop.permute.xlu1 %571  ;;  %v2052_v38 = vpop.permute.xlu0 %519 }
  0xef   : > { %686 = vrot.lane.b32.xlu1 %v295_v35, %s1606_s10  ;;  %638 = vrot.lane.b32.xlu0 %v454_v19, %s1605_s9 }
  0xf1   : > { %v778_v33 = vpop.permute.xlu1 %777  ;;  %v727_v39 = vpop.permute.xlu0 %726 }
  0xf2   : > { %v941_v51 = vsel %vm936_vm10, %v924_v31, %v778_v33  ;;  %v925_v46 = vsel %vm919_vm9, %v908_v32, %v727_v39  ;;  %v768_v39 = vsel %vm414_vm0, %v765_v36, %v767_v23 }
  0xf3   : > { %533 = vrot.lane.b32.xlu1 %v295_v35, %s1601_s5  ;;  %485 = vrot.lane.b32.xlu0 %v454_v19, %s1602_s6  ;;  %v712_v19 = vrot.slane %v299_v16, 1  ;;  %v824_v35 = vsel %vm817_vm3, %v1772_v44, %v2005_v3 }
  0xf4   : > { %1483 = vmatprep.mubr.msk.f32.mxu0 %vm958_vm11, %v941_v51  ;;  %v841_v1 = vsel %vm834_vm4, %v824_v35, %v2025_v10 }
  0xf5   : > { %v2074_v48 = vpop.permute.xlu1 %573  ;;  %v2076_v55 = vpop.permute.xlu0 %382  ;;  %v715_v25 = vsel %vm325_vm1, %v712_v19, %v714_v28  ;;  %v713_v6 = vsel %vm325_vm1, %v711_v26, %v712_v19  ;;  %v858_v21 = vsel %vm851_vm5, %v841_v1, %v2034_v20 }
  0xf6   : > { %v875_v44 = vsel %vm868_vm6, %v858_v21, %v2050_v37  ;;  %v825_v37 = vsel %vm817_vm3, %v1775_v45, %v2027_v14  ;;  %v826_v7 = vsel %vm817_vm3, %v1807_v57, %v2076_v55 }
  0xf7   : > { %740 = vrot.lane.b32.xlu1 %v556_v53, %s1607_s26  ;;  %688 = vrot.lane.b32.xlu0 %v296_v42, %s1606_s10  ;;  %v842_v54 = vsel %vm834_vm4, %v825_v37, %v2036_v22 }
  0xf8   : > { %v859_v56 = vsel %vm851_vm5, %v842_v54, %v2052_v38 }
  0xf9   : > { %v780_v34 = vpop.permute.xlu1 %779  ;;  %v625_v62 = vpop.permute.xlu0 %624  ;;  %v876_v32 = vsel %vm868_vm6, %v859_v56, %v2074_v48 }
  0xfa   : > { %v942_v40 = vsel %vm936_vm10, %v925_v46, %v780_v34  ;;  %v892_v3 = vsel %vm885_vm7, %v875_v44, %v625_v62 }
  0xfb   : > { %587 = vrot.lane.b32.xlu1 %v556_v53, %s1604_s8  ;;  %535 = vrot.lane.b32.xlu0 %v296_v42, %s1601_s5  ;;  %v764_v42 = vrot.slane %v298_v17, 2  ;;  %s249_s5 = sadd.s32 %s1583_s15, %s1421_s30 }
  0xfc   : > { %1484 = vmatmul.mubr.msk.f32.gmra.mxu0 %vm958_vm11, %v942_v40  ;;  %p250_p7 = scmp.lt.s32.totalorder %s249_s5, 3 }
  0xfd   : > { %v2092_v49 = vpop.permute.xlu1 %471  ;;  %v2094_v4 = vpop.permute.xlu0 %384  ;;  %v766_v51 = vsel %vm414_vm0, %v764_v42, %v765_v36 }
  0xfe   : > { %v827_v57 = vsel %vm817_vm3, %v1810_v58, %v2094_v4  ;;  %s2343_s5 = smov (!%p250_p7, %s249_s5), 3 }
  0xff   : > { %793 = vrot.lane.b32.xlu1 %v609_v61, %s1608_s29  ;;  %742 = vrot.lane.b32.xlu0 %v558_v63, %s1607_s26  ;;  %s1445_s15 = sshll.u32 %s2343_s5, 7  ;;  %s268_s13 = scalar_lea.vmem %s2331_s4, %s2343_s5 }
 0x100   : > { %s2217_s7 = scalar_lea.vmem %s2329_s2, %s1445_s15 }
 0x101   : > { %v675_v8 = vpop.permute.xlu1 %674  ;;  %v627_v9 = vpop.permute.xlu0 %626 }
 0x102   : > { %v909_v10 = vsel %vm902_vm8, %v892_v3, %v675_v8  ;;  %v893_v59 = vsel %vm885_vm7, %v876_v32, %v627_v9  ;;  %v843_v8 = vsel %vm834_vm4, %v826_v7, %v2092_v49 }
 0x103   : > { %640 = vrot.lane.b32.xlu1 %v609_v61, %s1605_s9  ;;  %589 = vrot.lane.b32.xlu0 %v558_v63, %s1604_s8 }
 0x105   : > { %v522_v11 = vpop.permute.xlu1 %521  ;;  %v2101_v13 = vpop.permute.xlu0 %473 }
 0x106   : > { %v860_v9 = vsel %vm851_vm5, %v843_v8, %v522_v11  ;;  %v844_v55 = vsel %vm834_vm4, %v827_v57, %v2101_v13 }
 0x107   : > { %642 = vrot.lane.b32.xlu1 %v611_v5, %s1605_s9  ;;  %795 = vrot.lane.b32.xlu0 %v611_v5, %s1608_s29 }
 0x109   : > { %v729_v29 = vpop.permute.xlu1 %728  ;;  %v677_v30 = vpop.permute.xlu0 %676 }
 0x10a   : > { %v926_v43 = vsel %vm919_vm9, %v909_v10, %v729_v29  ;;  %v910_v45 = vsel %vm902_vm8, %v893_v59, %v677_v30 }
 0x10b   : > { %692 = vrot.lane.b32.xlu1 %v299_v16, %s1606_s10  ;;  %690 = vrot.lane.b32.xlu0 %v298_v17, %s1606_s10  ;;  %s261_s10 = scalar_lea.vmem %s2330_s3, %s2343_s5 }
 0x10d   : > { %v576_v31 = vpop.permute.xlu1 %575  ;;  %v524_v33 = vpop.permute.xlu0 %523 }
 0x10e   : > { %v877_v17 = vsel %vm868_vm6, %v860_v9, %v576_v31  ;;  %v861_v49 = vsel %vm851_vm5, %v844_v55, %v524_v33 }
 0x10f   : > { %746 = vrot.lane.b32.xlu1 %v715_v25, %s1607_s26  ;;  %744 = vrot.lane.b32.xlu0 %v713_v6, %s1607_s26 }
 0x111   : > { %v782_v20 = vpop.permute.xlu1 %781  ;;  %v731_v52 = vpop.permute.xlu0 %730 }
 0x112   : > { %v943_v53 = vsel %vm936_vm10, %v926_v43, %v782_v20  ;;  %v927_v14 = vsel %vm919_vm9, %v910_v45, %v731_v52 }
 0x113   : > { %799 = vrot.lane.b32.xlu1 %v768_v39, %s1608_s29  ;;  %797 = vrot.lane.b32.xlu0 %v766_v51, %s1608_s29 }
 0x114   : > { %1486 = vmatprep.mubr.msk.f32.mxu0 %vm958_vm11, %v943_v53 }
 0x115   : > { %v578_v27 = vpop.permute.xlu1 %577  ;;  %v387_v24 = vpop.permute.xlu0 %386 }
 0x116   : > { %v878_v36 = vsel %vm868_vm6, %v861_v49, %v578_v27  ;;  %v828_v39 = vsel %vm817_vm3, %v1844_v12, %v387_v24 }
 0x119   : > { %v784_v60 = vpop.permute.xlu1 %783  ;;  %v629_v0 = vpop.permute.xlu0 %628 }
 0x11a   : > { %v944_v22 = vsel %vm936_vm10, %v927_v14, %v784_v60  ;;  %v894_v18 = vsel %vm885_vm7, %v877_v17, %v629_v0 }
 0x11b   : > { %1487 = vmatmul.mubr.msk.f32.gmra.mxu0 %vm958_vm11, %v944_v22 }
 0x11d   : > { %v476_v46 = vpop.permute.xlu1 %475  ;;  %v389_v34 = vpop.permute.xlu0 %388 }
 0x11e   : > { %v845_v51 = vsel %vm834_vm4, %v828_v39, %v476_v46  ;;  %v829_v12 = vsel %vm817_vm3, %v1847_v15, %v389_v34 }
 0x121   : > { %v679_v38 = vpop.permute.xlu1 %678  ;;  %v631_v62 = vpop.permute.xlu0 %630 }
 0x122   : > { %v911_v19 = vsel %vm902_vm8, %v894_v18, %v679_v38  ;;  %v895_v42 = vsel %vm885_vm7, %v878_v36, %v631_v62 }
 0x125   : > { %v526_v40 = vpop.permute.xlu1 %525  ;;  %v478_v61 = vpop.permute.xlu0 %477 }
 0x126   : > { %v862_v43 = vsel %vm851_vm5, %v845_v51, %v526_v40  ;;  %v846_v24 = vsel %vm834_vm4, %v829_v12, %v478_v61 }
 0x129   : > { %v733_v63 = vpop.permute.xlu1 %732  ;;  %v681_v48 = vpop.permute.xlu0 %680 }
 0x12a   : > { %v928_v26 = vsel %vm919_vm9, %v911_v19, %v733_v63  ;;  %v912_v1 = vsel %vm902_vm8, %v895_v42, %v681_v48 }
 0x12d   : > { %v580_v5 = vpop.permute.xlu1 %579  ;;  %v528_v16 = vpop.permute.xlu0 %527 }
 0x12e   : > { %v879_v53 = vsel %vm868_vm6, %v862_v43, %v580_v5  ;;  %v863_v45 = vsel %vm851_vm5, %v846_v24, %v528_v16 }
 0x131   : > { %v786_v28 = vpop.permute.xlu1 %785  ;;  %v735_v29 = vpop.permute.xlu0 %734 }
 0x132   : > { %v945_v30 = vsel %vm936_vm10, %v928_v26, %v786_v28  ;;  %v929_v25 = vsel %vm919_vm9, %v912_v1, %v735_v29 }
 0x133   : > { %1489 = vmatprep.mubr.msk.f32.mxu1 %vm958_vm11, %v945_v30 }
 0x135   : > { %v582_v11 = vpop.permute.xlu1 %581  ;;  %v391_v35 = vpop.permute.xlu0 %390 }
 0x136   : > { %v880_v0 = vsel %vm868_vm6, %v863_v45, %v582_v11  ;;  %v830_v16 = vsel %vm817_vm3, %v1894_v47, %v391_v35 }
 0x139   : > { %v788_v6 = vpop.permute.xlu1 %787  ;;  %v633_v23 = vpop.permute.xlu0 %632 }
 0x13a   : > { %v946_v58 = vsel %vm936_vm10, %v929_v25, %v788_v6  ;;  %v896_v37 = vsel %vm885_vm7, %v879_v53, %v633_v23 }
 0x13b   : > { %1490 = vmatmul.mubr.msk.f32.vlgmr.msra.gmra.mxu1 %vm958_vm11, %v946_v58 }
 0x13d   : > { %v480_v4 = vpop.permute.xlu1 %479  ;;  %v393_v13 = vpop.permute.xlu0 %392 }
 0x13e   : > { %v847_v17 = vsel %vm834_vm4, %v830_v16, %v480_v4  ;;  %v831_v11 = vsel %vm817_vm3, %v1902_v50, %v393_v13 }
 0x141   : > { %v683_v21 = vpop.permute.xlu1 %682  ;;  %v635_v31 = vpop.permute.xlu0 %634 }
 0x142   : > { %v913_v54 = vsel %vm902_vm8, %v896_v37, %v683_v21  ;;  %v897_v22 = vsel %vm885_vm7, %v880_v0, %v635_v31 }
 0x145   : > { %v530_v33 = vpop.permute.xlu1 %529  ;;  %v482_v44 = vpop.permute.xlu0 %481 }
 0x146   : > { %v864_v18 = vsel %vm851_vm5, %v847_v17, %v530_v33  ;;  %v848_v35 = vsel %vm834_vm4, %v831_v11, %v482_v44 }
 0x149   : > { %v737_v3 = vpop.permute.xlu1 %736  ;;  %v685_v10 = vpop.permute.xlu0 %684 }
 0x14a   : > { %v930_v56 = vsel %vm919_vm9, %v913_v54, %v737_v3  ;;  %v914_v46 = vsel %vm902_vm8, %v897_v22, %v685_v10 }
 0x14d   : > { %v584_v20 = vpop.permute.xlu1 %583  ;;  %v532_v52 = vpop.permute.xlu0 %531 }
 0x14e   : > { %v881_v28 = vsel %vm868_vm6, %v864_v18, %v584_v20  ;;  %v865_v36 = vsel %vm851_vm5, %v848_v35, %v532_v52 }
 0x151   : > { %v790_v27 = vpop.permute.xlu1 %789  ;;  %v739_v32 = vpop.permute.xlu0 %738 }
 0x152   : > { %v947_v59 = vsel %vm936_vm10, %v930_v56, %v790_v27  ;;  %v931_v38 = vsel %vm919_vm9, %v914_v46, %v739_v32 }
 0x153   : > { %1492 = vmatprep.mubr.msk.f32.mxu1 %vm958_vm11, %v947_v59 }
 0x155   : > { %v586_v14 = vpop.permute.xlu1 %585  ;;  %v395_v60 = vpop.permute.xlu0 %394 }
 0x156   : > { %v882_v25 = vsel %vm868_vm6, %v865_v36, %v586_v14  ;;  %v832_v3 = vsel %vm817_vm3, %v1969_v41, %v395_v60 }
 0x159   : > { %v792_v62 = vpop.permute.xlu1 %791  ;;  %v637_v15 = vpop.permute.xlu0 %636 }
 0x15a   : > { %v948_v34 = vsel %vm936_vm10, %v931_v38, %v792_v62  ;;  %v898_v29 = vsel %vm885_vm7, %v881_v28, %v637_v15 }
 0x15b   : > { %1493 = vmatmul.mubr.msk.f32.gmra.mxu1 %vm958_vm11, %v948_v34 }
 0x15d   : > { %v484_v40 = vpop.permute.xlu1 %483  ;;  %v397_v61 = vpop.permute.xlu0 %396 }
 0x15e   : > { %v833_v39 = vsel %vm817_vm3, %v1978_v2, %v397_v61  ;;  %v849_v52 = vsel %vm834_vm4, %v832_v3, %v484_v40 }
 0x161   : > { %v687_v63 = vpop.permute.xlu1 %686  ;;  %v639_v48 = vpop.permute.xlu0 %638 }
 0x162   : > { %v915_v30 = vsel %vm902_vm8, %v898_v29, %v687_v63  ;;  %v899_v6 = vsel %vm885_vm7, %v882_v25, %v639_v48 }
 0x165   : > { %v534_v7 = vpop.permute.xlu1 %533  ;;  %v486_v8 = vpop.permute.xlu0 %485 }
 0x166   : > { %v850_v53 = vsel %vm834_vm4, %v833_v39, %v486_v8  ;;  %v866_v54 = vsel %vm851_vm5, %v849_v52, %v534_v7 }
 0x169   : > { %v741_v9 = vpop.permute.xlu1 %740  ;;  %v689_v5 = vpop.permute.xlu0 %688 }
 0x16a   : > { %v932_v57 = vsel %vm919_vm9, %v915_v30, %v741_v9  ;;  %v916_v23 = vsel %vm902_vm8, %v899_v6, %v689_v5 }
 0x16d   : > { %v588_v19 = vpop.permute.xlu1 %587  ;;  %v536_v26 = vpop.permute.xlu0 %535 }
 0x16e   : > { %v867_v41 = vsel %vm851_vm5, %v850_v53, %v536_v26  ;;  %v883_v59 = vsel %vm868_vm6, %v866_v54, %v588_v19 }
 0x171   : > { %v794_v55 = vpop.permute.xlu1 %793  ;;  %v743_v49 = vpop.permute.xlu0 %742 }
 0x172   : > { %v949_v47 = vsel %vm936_vm10, %v932_v57, %v794_v55  ;;  %v933_v50 = vsel %vm919_vm9, %v916_v23, %v743_v49 }
 0x173   : > { %1495 = vmatprep.mubr.msk.f32.mxu1 %vm958_vm11, %v949_v47 }
 0x175   : > { %v641_v42 = vpop.permute.xlu1 %640  ;;  %v590_v1 = vpop.permute.xlu0 %589 }
 0x176   : > { %v884_v12 = vsel %vm868_vm6, %v867_v41, %v590_v1  ;;  %v900_v45 = vsel %vm885_vm7, %v883_v59, %v641_v42 }
 0x179   : > { %v643_v58 = vpop.permute.xlu1 %642  ;;  %v796_v4 = vpop.permute.xlu0 %795 }
 0x17a   : > { %v950_v13 = vsel %vm936_vm10, %v933_v50, %v796_v4  ;;  %v901_v14 = vsel %vm885_vm7, %v884_v12, %v643_v58 }
 0x17b   : > { %1496 = vmatmul.mubr.msk.f32.gmra.mxu1 %vm958_vm11, %v950_v13 }
 0x17c   : > { %v1479_v21 = vpop.f32.mrf.mxu0 }
 0x17d   : > { %1157 = vst.msk [vmem:[%s2217_s7 + $0x8] sm:$0xff] %vm834_vm4, %v1479_v21  ;;  %v1212_v31 = vmul.f32 %v1479_v21, %v1479_v21  ;;  %v693_v33 = vpop.permute.xlu1 %692  ;;  %v691_v44 = vpop.permute.xlu0 %690  ;;  %v1173_v51 = vsel %vm834_vm4, %v1479_v21, 0.0 }
 0x17e   : > { %v1077_v10 = vpop.f32.mrf.mxu0  ;;  %v918_v60 = vsel %vm902_vm8, %v901_v14, %v693_v33  ;;  %v917_v0 = vsel %vm902_vm8, %v900_v45, %v691_v44 }
 0x17f   : > { %1156 = vst.msk [vmem:[%s2217_s7] sm:$0xff] %vm834_vm4, %v1077_v10  ;;  %v1172_v43 = vsel %vm834_vm4, %v1077_v10, 0.0  ;;  %v1211_v20 = vmul.f32 %v1077_v10, %v1077_v10  ;;  %v1228_v56 = vsel %vm834_vm4, %v1212_v31, 0.0 }
 0x180   : > { %v1174_v37 = vadd.f32 %v1173_v51, %v1172_v43 }
 0x181   : > { %v1227_v2 = vsel %vm834_vm4, %v1211_v20, 0.0  ;;  %v747_v27 = vpop.permute.xlu1 %746  ;;  %v745_v32 = vpop.permute.xlu0 %744 }
 0x182   : > { %v1229_v24 = vadd.f32 %v1228_v56, %v1227_v2  ;;  %v935_v22 = vsel %vm919_vm9, %v918_v60, %v747_v27  ;;  %v934_v46 = vsel %vm919_vm9, %v917_v0, %v745_v32 }
 0x185   : > { %v800_v38 = vpop.permute.xlu1 %799  ;;  %v798_v62 = vpop.permute.xlu0 %797 }
 0x186   : > { %v952_v15 = vsel %vm936_vm10, %v935_v22, %v800_v38  ;;  %v951_v34 = vsel %vm936_vm10, %v934_v46, %v798_v62 }
 0x187   : > { %1498 = vmatprep.mubr.msk.f32.mxu1 %vm958_vm11, %v951_v34 }
 0x188   : > { %1499 = vmatmul.mubr.msk.f32.gmra.mxu1 %vm958_vm11, %v952_v15 }
 0x19c   : > { %v1482_v40 = vpop.f32.mrf.mxu0 }
 0x19d   : > { %1159 = vst.msk [vmem:[%s2217_s7 + $0x18] sm:$0xff] %vm834_vm4, %v1482_v40  ;;  %v1214_v63 = vmul.f32 %v1482_v40, %v1482_v40  ;;  %v1177_v9 = vsel %vm834_vm4, %v1482_v40, 0.0 }
 0x19e   : > { %v1087_v61 = vpop.f32.mrf.mxu0 }
 0x19f   : > { %1158 = vst.msk [vmem:[%s2217_s7 + $0x10] sm:$0xff] %vm834_vm4, %v1087_v61  ;;  %v1175_v48 = vsel %vm834_vm4, %v1087_v61, 0.0  ;;  %v1213_v7 = vmul.f32 %v1087_v61, %v1087_v61  ;;  %v1232_v18 = vsel %vm834_vm4, %v1214_v63, 0.0 }
 0x1a0   : > { %v1176_v8 = vadd.f32 %v1175_v48, %v1174_v37 }
 0x1a1   : > { %v1230_v5 = vsel %vm834_vm4, %v1213_v7, 0.0 }
 0x1a2   : > { %v1231_v16 = vadd.f32 %v1230_v5, %v1229_v24  ;;  %v1178_v17 = vadd.f32 %v1177_v9, %v1176_v8 }
 0x1a4   : > { %v1233_v19 = vadd.f32 %v1232_v18, %v1231_v16 }
 0x1bc   : > { %v1485_v26 = vpop.f32.mrf.mxu0 }
 0x1bd   : > { %1161 = vst.msk [vmem:[%s2217_s7 + $0x28] sm:$0xff] %vm834_vm4, %v1485_v26  ;;  %v1216_v29 = vmul.f32 %v1485_v26, %v1485_v26  ;;  %v1181_v49 = vsel %vm834_vm4, %v1485_v26, 0.0 }
 0x1be   : > { %v1097_v28 = vpop.f32.mrf.mxu0 }
 0x1bf   : > { %1160 = vst.msk [vmem:[%s2217_s7 + $0x20] sm:$0xff] %vm834_vm4, %v1097_v28  ;;  %v1179_v30 = vsel %vm834_vm4, %v1097_v28, 0.0  ;;  %v1215_v57 = vmul.f32 %v1097_v28, %v1097_v28  ;;  %v1236_v36 = vsel %vm834_vm4, %v1216_v29, 0.0 }
 0x1c0   : > { %v1180_v55 = vadd.f32 %v1179_v30, %v1178_v17 }
 0x1c1   : > { %v1234_v47 = vsel %vm834_vm4, %v1215_v57, 0.0 }
 0x1c2   : > { %v1235_v11 = vadd.f32 %v1234_v47, %v1233_v19  ;;  %v1182_v35 = vadd.f32 %v1181_v49, %v1180_v55 }
 0x1c4   : > { %v1237_v42 = vadd.f32 %v1236_v36, %v1235_v11 }
 0x1db   : > { %v1488_v1 = vpop.f32.mrf.mxu0 }
 0x1dc   : > { %1163 = vst.msk [vmem:[%s2217_s7 + $0x38] sm:$0xff] %vm834_vm4, %v1488_v1  ;;  %v1218_v6 = vmul.f32 %v1488_v1, %v1488_v1  ;;  %v1185_v4 = vsel %vm834_vm4, %v1488_v1, 0.0 }
 0x1dd   : > { %v1107_v25 = vpop.f32.mrf.mxu0 }
 0x1de   : > { %1162 = vst.msk [vmem:[%s2217_s7 + $0x30] sm:$0xff] %vm834_vm4, %v1107_v25  ;;  %v1183_v23 = vsel %vm834_vm4, %v1107_v25, 0.0  ;;  %v1217_v50 = vmul.f32 %v1107_v25, %v1107_v25  ;;  %v1240_v33 = vsel %vm834_vm4, %v1218_v6, 0.0 }
 0x1df   : > { %v1184_v58 = vadd.f32 %v1183_v23, %v1182_v35 }
 0x1e0   : > { %v1238_v13 = vsel %vm834_vm4, %v1217_v50, 0.0 }
 0x1e1   : > { %v1186_v21 = vadd.f32 %v1185_v4, %v1184_v58  ;;  %v1239_v31 = vadd.f32 %v1238_v13, %v1237_v42 }
 0x1e3   : > { %v1241_v44 = vadd.f32 %v1240_v33, %v1239_v31 }
 0x1fb   : > { %v1491_v3 = vpop.f32.mrf.mxu1 }
 0x1fc   : > { %1165 = vst.msk [vmem:[%s2217_s7 + $0x48] sm:$0xff] %vm834_vm4, %v1491_v3  ;;  %v1220_v39 = vmul.f32 %v1491_v3, %v1491_v3  ;;  %v1189_v52 = vsel %vm834_vm4, %v1491_v3, 0.0 }
 0x1fd   : > { %v1117_v10 = vpop.f32.mrf.mxu1 }
 0x1fe   : > { %1164 = vst.msk [vmem:[%s2217_s7 + $0x40] sm:$0xff] %vm834_vm4, %v1117_v10  ;;  %v1187_v51 = vsel %vm834_vm4, %v1117_v10, 0.0  ;;  %v1219_v43 = vmul.f32 %v1117_v10, %v1117_v10  ;;  %v1244_v41 = vsel %vm834_vm4, %v1220_v39, 0.0 }
 0x1ff   : > { %v1188_v20 = vadd.f32 %v1187_v51, %v1186_v21 }
 0x200   : > { %v1242_v53 = vsel %vm834_vm4, %v1219_v43, 0.0 }
 0x201   : > { %v1243_v37 = vadd.f32 %v1242_v53, %v1241_v44  ;;  %v1190_v54 = vadd.f32 %v1189_v52, %v1188_v20 }
 0x203   : > { %v1245_v56 = vadd.f32 %v1244_v41, %v1243_v37 }
 0x21b   : > { %v1494_v2 = vpop.f32.mrf.mxu1 }
 0x21c   : > { %1167 = vst.msk [vmem:[%s2217_s7 + $0x58] sm:$0xff] %vm834_vm4, %v1494_v2  ;;  %v1222_v60 = vmul.f32 %v1494_v2, %v1494_v2  ;;  %v1193_v46 = vsel %vm834_vm4, %v1494_v2, 0.0 }
 0x21d   : > { %v1127_v27 = vpop.f32.mrf.mxu1 }
 0x21e   : > { %1166 = vst.msk [vmem:[%s2217_s7 + $0x50] sm:$0xff] %vm834_vm4, %v1127_v27  ;;  %v1221_v32 = vmul.f32 %v1127_v27, %v1127_v27  ;;  %v1191_v12 = vsel %vm834_vm4, %v1127_v27, 0.0  ;;  %v1248_v15 = vsel %vm834_vm4, %v1222_v60, 0.0 }
 0x21f   : > { %v1192_v14 = vadd.f32 %v1191_v12, %v1190_v54 }
 0x220   : > { %v1246_v45 = vsel %vm834_vm4, %v1221_v32, 0.0 }
 0x221   : > { %v1247_v22 = vadd.f32 %v1246_v45, %v1245_v56  ;;  %v1194_v62 = vadd.f32 %v1193_v46, %v1192_v14 }
 0x223   : > { %v1249_v61 = vadd.f32 %v1248_v15, %v1247_v22 }
 0x23b   : > { %v1497_v59 = vpop.f32.mrf.mxu1 }
 0x23c   : > { %1169 = vst.msk [vmem:[%s2217_s7 + $0x68] sm:$0xff] %vm834_vm4, %v1497_v59  ;;  %v1224_v63 = vmul.f32 %v1497_v59, %v1497_v59  ;;  %v1197_v8 = vsel %vm834_vm4, %v1497_v59, 0.0 }
 0x23d   : > { %v1137_v24 = vpop.f32.mrf.mxu1 }
 0x23e   : > { %1168 = vst.msk [vmem:[%s2217_s7 + $0x60] sm:$0xff] %vm834_vm4, %v1137_v24  ;;  %v1223_v0 = vmul.f32 %v1137_v24, %v1137_v24  ;;  %v1195_v38 = vsel %vm834_vm4, %v1137_v24, 0.0  ;;  %v1252_v16 = vsel %vm834_vm4, %v1224_v63, 0.0 }
 0x23f   : > { %v1196_v40 = vadd.f32 %v1195_v38, %v1194_v62 }
 0x240   : > { %v1250_v34 = vsel %vm834_vm4, %v1223_v0, 0.0 }
 0x241   : > { %v1251_v48 = vadd.f32 %v1250_v34, %v1249_v61  ;;  %v1198_v5 = vadd.f32 %v1197_v8, %v1196_v40 }
 0x243   : > { %v1253_v28 = vadd.f32 %v1252_v16, %v1251_v48 }
 0x248   : > { %v1500_v7 = vpop.f32.mrf.mxu1 }
 0x249   : > { %1171 = vst.msk [vmem:[%s2217_s7 + $0x78] sm:$0xff] %vm834_vm4, %v1500_v7  ;;  %v1226_v17 = vmul.f32 %v1500_v7, %v1500_v7  ;;  %v1201_v29 = vsel %vm834_vm4, %v1500_v7, 0.0 }
 0x24a   : > { %v1147_v9 = vpop.f32.mrf.mxu1 }
 0x24b   : > { %1170 = vst.msk [vmem:[%s2217_s7 + $0x70] sm:$0xff] %vm834_vm4, %v1147_v9  ;;  %v1199_v18 = vsel %vm834_vm4, %v1147_v9, 0.0  ;;  %v1225_v19 = vmul.f32 %v1147_v9, %v1147_v9  ;;  %v1256_v49 = vsel %vm834_vm4, %v1226_v17, 0.0 }
 0x24c   : > { %v1200_v26 = vadd.f32 %v1199_v18, %v1198_v5 }
 0x24d   : > { %v1254_v30 = vsel %vm834_vm4, %v1225_v19, 0.0 }
 0x24e   : > { %v1202_v57 = vadd.f32 %v1201_v29, %v1200_v26  ;;  %v1255_v55 = vadd.f32 %v1254_v30, %v1253_v28 }
 0x250   : > { %v1203_v47 = vrot.slane %v1202_v57, 4  ;;  %v1257_v11 = vadd.f32 %v1256_v49, %v1255_v55 }
 0x252   : > { %v1204_v35 = vadd.f32 %v1203_v47, %v1202_v57  ;;  %v1258_v36 = vrot.slane %v1257_v11, 4 }
 0x254   : > { %v1205_v42 = vrot.slane %v1204_v35, 2  ;;  %v1259_v1 = vadd.f32 %v1258_v36, %v1257_v11 }
 0x256   : > { %v1206_v25 = vadd.f32 %v1205_v42, %v1204_v35  ;;  %v1260_v6 = vrot.slane %v1259_v1, 2 }
 0x258   : > { %v1207_v23 = vrot.slane %v1206_v25, 1  ;;  %v1261_v50 = vadd.f32 %v1260_v6, %v1259_v1 }
 0x25a   : > { %v1208_v58 = vadd.f32 %v1207_v23, %v1206_v25  ;;  %v1262_v4 = vrot.slane %v1261_v50, 1 }
 0x25c   : > { %1210 = vst.msk [vmem:[%s261_s10] sm:$0x1] %vm1209_vm12, %v1208_v58  ;;  %v1263_v13 = vadd.f32 %v1262_v4, %v1261_v50 }
 0x25e   : > { %1264 = vst.msk [vmem:[%s268_s13] sm:$0x1] %vm1209_vm12, %v1263_v13 }
 0x25f PF: > { %s15_s19 = sadd.s32 1, %s1599_s19   ;;  %s2332_s15 = smov %s1591_s17 }
 0x260   : > { %p12_p8 = scmp.ge.s32.totalorder %s15_s19, 6   ;;  %s2333_s16 = smov %s1595_s18 }
 0x261   : > { %s2334_s17 = smov %s2337_s20  ;;  %s2335_s18 = smov %s2341_s21 }
 0x262   :  { %14 = sbr.rel (!%p12_p8) target bundleno = 3 (0x3), region = 82 }

// kernel: flexible_double_conv.6
= control target key start
LH: loop header
LB: loop body
LE: loop exit
PB: predicated region body
PF: predicated region fallthrough
CT: control target
= control target key end

     0   :  { %s1653_s15 = smov 0   ;;  %s1655_s16 = smov 0   ;;  %s2358_s0 = inlined_call_operand.vmem [shape: f32[2,2,10,18,8], index: 0, kind: input, shape index: {}]   ;;  %s2359_s1 = inlined_call_operand.vmem [shape: f32[72,8], index: 1, kind: input, shape index: {}]   ;;  %s2360_s2 = inlined_call_operand.vmem [shape: f32[4,128,8], index: 2, kind: output, shape index: {0}]   ;;  %s2361_s3 = inlined_call_operand.vmem [shape: f32[4,1,8], index: 3, kind: output, shape index: {1}]   ;;  %s2362_s4 = inlined_call_operand.vmem [shape: f32[4,1,8], index: 4, kind: output, shape index: {2}]  }
   0x1   :  { %s1657_s17 = smov 0   ;;  %s1659_s18 = smov 0  }
   0x2   :  { %s1661_s19 = smov 0  }
   0x3 LB: > { %s24_s20 = sadd.s32 1, %s1610_s17  ;;  %s27_s21 = sadd.s32 1, %s1614_s18  ;;  %s1618_s19 = sphi %s1661_s19, %s15_s19   ;;  %s1614_s18 = sphi %s1659_s18, %s2366_s18   ;;  %s1610_s17 = sphi %s1657_s17, %s2365_s17   ;;  %s1606_s16 = sphi %s1655_s16, %s2364_s16   ;;  %s1602_s15 = sphi %s1653_s15, %s2363_s15  }
   0x4   : > { %p25_p0 = scmp.ge.s32.totalorder %s24_s20, 2  ;;  %p1419_p1 = scmp.ge.s32.totalorder %s1618_s19, 1 }
   0x5   : > { %p197_p2 = scmp.lt.s32.totalorder %s1618_s19, 5 }
   0x6   : > { %s2368_s20 = smov (%p25_p0, %s24_s20), 0  ;;  %s2370_s21 = smov (!%p25_p0, %s27_s21), %s1614_s18 }
   0x7   : > { %p198_p3 = pnand %p1419_p1, %p197_p2  ;;  %p29_p4 = scmp.ge.s32.totalorder %s2370_s21, 2 }
   0x8   : > { %p239_p5 = scmp.lt.s32.totalorder (!%p198_p3), %s1606_s16, 1  ;;  %p241_p6 = scmp.lt.s32.totalorder (!%p198_p3), %s1602_s15, 1 }
   0x9   : > { %s2372_s21 = smov (%p29_p4, %s2370_s21), 0  ;;  %201 = sbr.rel (%p198_p3) target bundleno = 607 (0x25f), region = 28 }
   0xa   : > { %s1620_s5 = smov (!%p198_p3), 24   ;;  %s1621_s6 = smov (!%p198_p3), 16  }
   0xb   : > { %s1622_s7 = smov (!%p198_p3), 8   ;;  %s1623_s8 = smov (!%p198_p3), 32  }
   0xc   : > { %s1624_s9 = smov (!%p198_p3), 40   ;;  %s1626_s12 = smov (!%p198_p3), 56  }
   0xe   : > { %s240_s22 = scalar_select %p239_p5, %s1606_s16, 1  ;;  %vm414_vm0 = vcmask 1045504   ;;  %vm325_vm1 = vcmask 1046528   ;;  %v961_v24 = vld [vmem:[%s2359_s1 + $0x40] sm:$0xff]  ;;  %v960_v26 = vld [vmem:[%s2359_s1 + $0x38] sm:$0xff]  ;;  %v959_v27 = vld [vmem:[%s2359_s1 + $0x30] sm:$0xff] }
   0xf   : > { %s242_s23 = scalar_select %p241_p6, %s1602_s15, 1  ;;  %1470 = vmatprep.subr.mxu0 %v961_v24  ;;  %1512 = vmatprep.subr.mxu1 %v961_v24  ;;  %v958_v31 = vld [vmem:[%s2359_s1 + $0x28] sm:$0xff]  ;;  %v957_v34 = vld [vmem:[%s2359_s1 + $0x20] sm:$0xff]  ;;  %v956_v35 = vld [vmem:[%s2359_s1 + $0x18] sm:$0xff]  ;;  %vm817_vm2 = vcmask 64512   ;;  %vm834_vm3 = vcmask 130048  }
  0x10   : > { %s1531_s24 = smul.u32 60, %s240_s22  ;;  %1471 = vmatpush3.msra.mxu0 %v961_v24  ;;  %1521 = vmatpush3.msra.mxu1 %v961_v24  ;;  %v955_v38 = vld [vmem:[%s2359_s1 + $0x10] sm:$0xff]  ;;  %v954_v42 = vld [vmem:[%s2359_s1 + $0x8] sm:$0xff]  ;;  %v953_v43 = vld [vmem:[%s2359_s1] sm:$0xff]  ;;  %vm851_vm4 = vcmask 195584   ;;  %vm868_vm5 = vcmask 261120  }
  0x11   : > { %s1530_s25 = smul.u32 30, %s242_s23  ;;  %1472 = vmatprep.subr.mxu0 %v960_v26  ;;  %1513 = vmatprep.subr.mxu1 %v960_v26  ;;  %vm885_vm6 = vcmask 326656   ;;  %vm902_vm7 = vcmask 392192   ;;  %vm919_vm8 = vcmask 457728   ;;  %vm936_vm9 = vcmask 523264  }
  0x12   : > { %1473 = vmatpush3.msra.mxu0 %v960_v26  ;;  %1522 = vmatpush3.msra.mxu1 %v960_v26  ;;  %vm962_vm10 = vcmask 588800   ;;  %vm1209_vm11 = vcmask 57344  }
  0x13   : > { %s245_s26 = sadd.s32 %s1531_s24, %s1530_s25  ;;  %1474 = vmatprep.subr.mxu0 %v959_v27  ;;  %1514 = vmatprep.subr.mxu1 %v959_v27  ;;  %s1625_s25 = smov 48  }
  0x14   : > { %s1420_s27 = sshll.u32 %s245_s26, 3  ;;  %1475 = vmatpush3.msra.mxu0 %v959_v27  ;;  %1523 = vmatpush3.msra.mxu1 %v959_v27  ;;  %s1627_s24 = smov 64  }
  0x15   : > { %s1694_s30 = scalar_lea.vmem %s2358_s0, %s1420_s27  ;;  %1476 = vmatprep.subr.mxu0 %v958_v31  ;;  %1515 = vmatprep.subr.mxu1 %v958_v31 }
  0x16   : > { %v1697_v0 = vld [vmem:[%s1694_s30 + $0x20] sm:$0xff]  ;;  %v1700_v1 = vld [vmem:[%s1694_s30 + $0x18] sm:$0xff]  ;;  %v1710_v3 = vld [vmem:[%s1694_s30 + $0x8] sm:$0xff]  ;;  %1477 = vmatpush3.msra.mxu0 %v958_v31  ;;  %1524 = vmatpush3.msra.mxu1 %v958_v31 }
  0x17   : > { %v1703_v2 = vld [vmem:[%s1694_s30] sm:$0xff]  ;;  %507 = vrot.lane.b32.xlu1 %v1697_v0, %s1620_s5  ;;  %505 = vrot.lane.b32.xlu0 %v1700_v1, %s1620_s5  ;;  %v273_v6 = vld [vmem:[%s1694_s30 + $0x10] sm:$0x3]  ;;  %v416_v7 = vrot.slane %v1710_v3, 2  ;;  %v327_v8 = vrot.slane %v1710_v3, 1  ;;  %v331_v15 = vrot.slane %v1700_v1, 1 }
  0x18   : > { %v415_v4 = vrot.slane %v1703_v2, 2  ;;  %v326_v5 = vrot.slane %v1703_v2, 1  ;;  %v418_v9 = vrot.slane %v273_v6, 2  ;;  %v329_v10 = vrot.slane %v273_v6, 1  ;;  %v276_v17 = vld [vmem:[%s1694_s30 + $0x28] sm:$0x3]  ;;  %1478 = vmatprep.subr.mxu0 %v957_v34  ;;  %1516 = vmatprep.subr.mxu1 %v957_v34 }
  0x19   : > { %v332_v16 = vrot.slane %v1697_v0, 1  ;;  %v420_v19 = vrot.slane %v1700_v1, 2  ;;  %v421_v20 = vrot.slane %v1697_v0, 2  ;;  %v334_v21 = vrot.slane %v276_v17, 1  ;;  %v1749_v28 = vld [vmem:[%s1694_s30 + $0x30] sm:$0xff]  ;;  %v1753_v30 = vld [vmem:[%s1694_s30 + $0x38] sm:$0xff]  ;;  %1479 = vmatpush3.msra.mxu0 %v957_v34  ;;  %1525 = vmatpush3.msra.mxu1 %v957_v34 }
  0x1a   : > { %v417_v11 = vsel %vm414_vm0, %v415_v4, %v416_v7  ;;  %v328_v12 = vsel %vm325_vm1, %v326_v5, %v327_v8  ;;  %v419_v13 = vsel %vm414_vm0, %v416_v7, %v418_v9  ;;  %v330_v14 = vsel %vm325_vm1, %v327_v8, %v329_v10  ;;  %v279_v37 = vld [vmem:[%s1694_s30 + $0x40] sm:$0x3]  ;;  %1480 = vmatprep.subr.mxu0 %v956_v35  ;;  %v1803_v48 = vld [vmem:[%s1694_s30 + $0x48] sm:$0xff]  ;;  %v1806_v49 = vld [vmem:[%s1694_s30 + $0x50] sm:$0xff] }
  0x1b   : > { %455 = vrot.lane.b32.xlu1 %v417_v11, %s1621_s6  ;;  %366 = vrot.lane.b32.xlu0 %v328_v12, %s1622_s7  ;;  %v333_v18 = vsel %vm325_vm1, %v331_v15, %v332_v16  ;;  %v422_v22 = vsel %vm414_vm0, %v420_v19, %v421_v20  ;;  %v335_v23 = vsel %vm325_vm1, %v332_v16, %v334_v21  ;;  %v423_v25 = vrot.slane %v276_v17, 2  ;;  %v282_v53 = vld [vmem:[%s1694_s30 + $0x58] sm:$0x3]  ;;  %v1838_v61 = vld [vmem:[%s1694_s30 + $0x60] sm:$0xff] }
  0x1c   : > { %v336_v32 = vrot.slane %v1749_v28, 1  ;;  %v337_v33 = vrot.slane %v1753_v30, 1  ;;  %1517 = vmatprep.subr.mxu1 %v956_v35  ;;  %v425_v39 = vrot.slane %v1749_v28, 2  ;;  %v426_v40 = vrot.slane %v1753_v30, 2  ;;  %1481 = vmatpush3.msra.mxu0 %v956_v35  ;;  %v1841_v62 = vld [vmem:[%s1694_s30 + $0x68] sm:$0xff]  ;;  %v1875_v16 = vld [vmem:[%s1694_s30 + $0x78] sm:$0xff] }
  0x1d   : > { %v424_v29 = vsel %vm414_vm0, %v421_v20, %v423_v25  ;;  %v339_v41 = vrot.slane %v279_v37, 1  ;;  %1526 = vmatpush3.msra.mxu1 %v956_v35  ;;  %1482 = vmatprep.subr.mxu0 %v955_v38  ;;  %v428_v46 = vrot.slane %v279_v37, 2  ;;  %v341_v50 = vrot.slane %v1803_v48, 1  ;;  %v285_v6 = vld [vmem:[%s1694_s30 + $0x70] sm:$0x3]  ;;  %v1878_v19 = vld [vmem:[%s1694_s30 + $0x80] sm:$0xff] }
  0x1e   : > { %v338_v36 = vsel %vm325_vm1, %v336_v32, %v337_v33  ;;  %1518 = vmatprep.subr.mxu1 %v955_v38  ;;  %1483 = vmatpush3.msra.mxu0 %v955_v38  ;;  %v427_v44 = vsel %vm414_vm0, %v425_v39, %v426_v40  ;;  %v342_v51 = vrot.slane %v1806_v49, 1  ;;  %v430_v54 = vrot.slane %v1803_v48, 2  ;;  %v288_v27 = vld [vmem:[%s1694_s30 + $0x88] sm:$0x3] }
  0x1f   : > { %457 = vrot.lane.b32.xlu1 %v419_v13, %s1621_s6  ;;  %368 = vrot.lane.b32.xlu0 %v330_v14, %s1622_s7  ;;  %v340_v45 = vsel %vm325_vm1, %v337_v33, %v339_v41  ;;  %v429_v47 = vsel %vm414_vm0, %v426_v40, %v428_v46  ;;  %v431_v55 = vrot.slane %v1806_v49, 2  ;;  %v344_v56 = vrot.slane %v282_v53, 1 }
  0x20   : > { %1527 = vmatpush3.msra.mxu1 %v955_v38  ;;  %1484 = vmatprep.subr.mxu0 %v954_v42  ;;  %v343_v52 = vsel %vm325_vm1, %v341_v50, %v342_v51  ;;  %v433_v59 = vrot.slane %v282_v53, 2  ;;  %v346_v63 = vrot.slane %v1838_v61, 1  ;;  %v347_v4 = vrot.slane %v1841_v62, 1 }
  0x21   : > { %1519 = vmatprep.subr.mxu1 %v954_v42  ;;  %1485 = vmatpush3.msra.mxu0 %v954_v42  ;;  %v432_v57 = vsel %vm414_vm0, %v430_v54, %v431_v55  ;;  %v345_v58 = vsel %vm325_vm1, %v342_v51, %v344_v56  ;;  %v435_v7 = vrot.slane %v1838_v61, 2  ;;  %v436_v8 = vrot.slane %v1841_v62, 2  ;;  %v1925_v51 = vld [vmem:[%s1694_s30 + $0x90] sm:$0xff]  ;;  %v1933_v54 = vld [vmem:[%s1694_s30 + $0x98] sm:$0xff] }
  0x22   : > { %1528 = vmatpush3.msra.mxu1 %v954_v42  ;;  %1486 = vmatprep.subr.mxu0 %v953_v43  ;;  %v434_v60 = vsel %vm414_vm0, %v431_v55, %v433_v59  ;;  %v348_v5 = vsel %vm325_vm1, %v346_v63, %v347_v4  ;;  %v349_v9 = vrot.slane %v285_v6, 1  ;;  %v438_v12 = vrot.slane %v285_v6, 2 }
  0x23   : > { %370 = vrot.lane.b32.xlu1 %v333_v18, %s1622_s7  ;;  %559 = vrot.lane.b32.xlu0 %v333_v18, %s1623_s8  ;;  %v437_v10 = vsel %vm414_vm0, %v435_v7, %v436_v8  ;;  %v351_v20 = vrot.slane %v1875_v16, 1  ;;  %v352_v21 = vrot.slane %v1878_v19, 1  ;;  %v441_v31 = vrot.slane %v1878_v19, 2 }
  0x24   : > { %1520 = vmatprep.subr.mxu1 %v953_v43  ;;  %1487 = vmatpush3.msra.mxu0 %v953_v43  ;;  %v350_v11 = vsel %vm325_vm1, %v347_v4, %v349_v9  ;;  %v439_v13 = vsel %vm414_vm0, %v436_v8, %v438_v12  ;;  %v354_v32 = vrot.slane %v288_v27, 1  ;;  %v443_v39 = vrot.slane %v288_v27, 2 }
  0x25   : > { %1529 = vmatpush3.msra.mxu1 %v953_v43  ;;  %v353_v24 = vsel %vm325_vm1, %v351_v20, %v352_v21  ;;  %v356_v59 = vrot.slane %v1925_v51, 1 }
  0x26   : > { %v444_v42 = vsel %vm414_vm0, %v441_v31, %v443_v39 }
  0x27   : > { %612 = vrot.lane.b32.xlu1 %v422_v22, %s1624_s9  ;;  %561 = vrot.lane.b32.xlu0 %v335_v23, %s1623_s8 }
  0x2b   : > { %459 = vrot.lane.b32.xlu1 %v422_v22, %s1621_s6  ;;  %372 = vrot.lane.b32.xlu0 %v335_v23, %s1622_s7 }
  0x2f   : > { %662 = vrot.lane.b32.xlu1 %v1749_v28, %s1625_s25  ;;  %614 = vrot.lane.b32.xlu0 %v424_v29, %s1624_s9 }
  0x33   : > { %509 = vrot.lane.b32.xlu1 %v1749_v28, %s1620_s5  ;;  %461 = vrot.lane.b32.xlu0 %v424_v29, %s1621_s6  ;;  %v440_v29 = vrot.slane %v1875_v16, 2 }
  0x35   : > { %v442_v35 = vsel %vm414_vm0, %v440_v29, %v441_v31 }
  0x37   : > { %716 = vrot.lane.b32.xlu1 %v338_v36, %s1626_s12  ;;  %664 = vrot.lane.b32.xlu0 %v1753_v30, %s1625_s25 }
  0x3b   : > { %563 = vrot.lane.b32.xlu1 %v338_v36, %s1623_s8  ;;  %511 = vrot.lane.b32.xlu0 %v1753_v30, %s1620_s5 }
  0x3f   : > { %769 = vrot.lane.b32.xlu1 %v427_v44, %s1627_s24  ;;  %718 = vrot.lane.b32.xlu0 %v340_v45, %s1626_s12 }
  0x43   : > { %565 = vrot.lane.b32.xlu1 %v340_v45, %s1623_s8  ;;  %374 = vrot.lane.b32.xlu0 %v338_v36, %s1622_s7  ;;  %v355_v36 = vsel %vm325_vm1, %v352_v21, %v354_v32 }
  0x47   : > { %771 = vrot.lane.b32.xlu1 %v429_v47, %s1627_s24  ;;  %616 = vrot.lane.b32.xlu0 %v427_v44, %s1624_s9 }
  0x4b   : > { %463 = vrot.lane.b32.xlu1 %v427_v44, %s1621_s6  ;;  %376 = vrot.lane.b32.xlu0 %v340_v45, %s1622_s7 }
  0x4f   : > { %666 = vrot.lane.b32.xlu1 %v1803_v48, %s1625_s25  ;;  %618 = vrot.lane.b32.xlu0 %v429_v47, %s1624_s9 }
  0x53   : > { %513 = vrot.lane.b32.xlu1 %v1803_v48, %s1620_s5  ;;  %465 = vrot.lane.b32.xlu0 %v429_v47, %s1621_s6 }
  0x57   : > { %720 = vrot.lane.b32.xlu1 %v343_v52, %s1626_s12  ;;  %668 = vrot.lane.b32.xlu0 %v1806_v49, %s1625_s25 }
  0x5b   : > { %567 = vrot.lane.b32.xlu1 %v343_v52, %s1623_s8  ;;  %515 = vrot.lane.b32.xlu0 %v1806_v49, %s1620_s5 }
  0x5f   : > { %773 = vrot.lane.b32.xlu1 %v432_v57, %s1627_s24  ;;  %722 = vrot.lane.b32.xlu0 %v345_v58, %s1626_s12 }
  0x63   : > { %569 = vrot.lane.b32.xlu1 %v345_v58, %s1623_s8  ;;  %378 = vrot.lane.b32.xlu0 %v343_v52, %s1622_s7 }
  0x67   : > { %775 = vrot.lane.b32.xlu1 %v434_v60, %s1627_s24  ;;  %620 = vrot.lane.b32.xlu0 %v432_v57, %s1624_s9 }
  0x6b   : > { %467 = vrot.lane.b32.xlu1 %v432_v57, %s1621_s6  ;;  %380 = vrot.lane.b32.xlu0 %v345_v58, %s1622_s7 }
  0x6f   : > { %670 = vrot.lane.b32.xlu1 %v1838_v61, %s1625_s25  ;;  %622 = vrot.lane.b32.xlu0 %v434_v60, %s1624_s9 }
  0x73   : > { %517 = vrot.lane.b32.xlu1 %v1838_v61, %s1620_s5  ;;  %469 = vrot.lane.b32.xlu0 %v434_v60, %s1621_s6  ;;  %v357_v60 = vrot.slane %v1933_v54, 1 }
  0x75   : > { %v358_v7 = vsel %vm325_vm1, %v356_v59, %v357_v60 }
  0x77   : > { %724 = vrot.lane.b32.xlu1 %v348_v5, %s1626_s12  ;;  %672 = vrot.lane.b32.xlu0 %v1841_v62, %s1625_s25 }
  0x7b   : > { %571 = vrot.lane.b32.xlu1 %v348_v5, %s1623_s8  ;;  %519 = vrot.lane.b32.xlu0 %v1841_v62, %s1620_s5 }
  0x7f   : > { %777 = vrot.lane.b32.xlu1 %v437_v10, %s1627_s24  ;;  %726 = vrot.lane.b32.xlu0 %v350_v11, %s1626_s12 }
  0x83   : > { %573 = vrot.lane.b32.xlu1 %v350_v11, %s1623_s8  ;;  %382 = vrot.lane.b32.xlu0 %v348_v5, %s1622_s7 }
  0x87   : > { %779 = vrot.lane.b32.xlu1 %v439_v13, %s1627_s24  ;;  %624 = vrot.lane.b32.xlu0 %v437_v10, %s1624_s9 }
  0x89   : > { %v1870_v14 = vpop.permute.xlu1 %507  ;;  %v506_v15 = vpop.permute.xlu0 %505 }
  0x8b   : > { %471 = vrot.lane.b32.xlu1 %v437_v10, %s1621_s6  ;;  %384 = vrot.lane.b32.xlu0 %v350_v11, %s1622_s7  ;;  %v291_v11 = vld [vmem:[%s1694_s30 + $0xa0] sm:$0x3] }
  0x8c   : > { %v448_v31 = vrot.slane %v291_v11, 2 }
  0x8d   : > { %v456_v17 = vpop.permute.xlu1 %455  ;;  %v367_v18 = vpop.permute.xlu0 %366 }
  0x8e   : > { %v818_v45 = vsel %vm817_vm2, %v1703_v2, %v367_v18  ;;  %v359_v18 = vrot.slane %v291_v11, 1 }
  0x8f   : > { %674 = vrot.lane.b32.xlu1 %v1875_v16, %s1625_s25  ;;  %626 = vrot.lane.b32.xlu0 %v439_v13, %s1624_s9  ;;  %v835_v50 = vsel %vm834_vm3, %v818_v45, %v456_v17  ;;  %v445_v17 = vrot.slane %v1925_v51, 2  ;;  %v2000_v45 = vld [vmem:[%s1694_s30 + $0xa8] sm:$0xff] }
  0x90   : > { %v852_v2 = vsel %vm851_vm4, %v835_v50, %v506_v15 }
  0x91   : > { %v1885_v22 = vpop.permute.xlu1 %457  ;;  %v369_v23 = vpop.permute.xlu0 %368 }
  0x92   : > { %v819_v56 = vsel %vm817_vm2, %v1710_v3, %v369_v23 }
  0x93   : > { %521 = vrot.lane.b32.xlu1 %v1875_v16, %s1620_s5  ;;  %473 = vrot.lane.b32.xlu0 %v439_v13, %s1621_s6  ;;  %v836_v3 = vsel %vm834_vm3, %v819_v56, %v1885_v22 }
  0x94   : > { %v853_v8 = vsel %vm851_vm4, %v836_v3, %v1870_v14  ;;  %v446_v14 = vrot.slane %v1933_v54, 2 }
  0x95   : > { %v1891_v25 = vpop.permute.xlu1 %370  ;;  %v560_v26 = vpop.permute.xlu0 %559 }
  0x96   : > { %v869_v55 = vsel %vm868_vm5, %v852_v2, %v560_v26  ;;  %v360_v26 = vsel %vm325_vm1, %v357_v60, %v359_v18  ;;  %v2009_v2 = vld [vmem:[%s1694_s30 + $0xb0] sm:$0xff] }
  0x97   : > { %728 = vrot.lane.b32.xlu1 %v353_v24, %s1626_s12  ;;  %676 = vrot.lane.b32.xlu0 %v1878_v19, %s1625_s25 }
  0x99   : > { %v613_v33 = vpop.permute.xlu1 %612  ;;  %v562_v34 = vpop.permute.xlu0 %561 }
  0x9a   : > { %v886_v57 = vsel %vm885_vm6, %v869_v55, %v613_v33  ;;  %v870_v12 = vsel %vm868_vm5, %v853_v8, %v562_v34  ;;  %v449_v34 = vsel %vm414_vm0, %v446_v14, %v448_v31  ;;  %v362_v55 = vrot.slane %v2009_v2, 1 }
  0x9b   : > { %575 = vrot.lane.b32.xlu1 %v353_v24, %s1623_s8  ;;  %523 = vrot.lane.b32.xlu0 %v1878_v19, %s1620_s5 }
  0x9d   : > { %v1904_v37 = vpop.permute.xlu1 %459  ;;  %v1906_v38 = vpop.permute.xlu0 %372 }
  0x9e   : > { %v821_v59 = vsel %vm817_vm2, %v1697_v0, %v1906_v38  ;;  %v294_v0 = vld [vmem:[%s1694_s30 + $0xb8] sm:$0x3] }
  0x9f   : > { %781 = vrot.lane.b32.xlu1 %v442_v35, %s1627_s24  ;;  %730 = vrot.lane.b32.xlu0 %v355_v36, %s1626_s12  ;;  %v364_v8 = vrot.slane %v294_v0, 1 }
  0xa1   : > { %v663_v40 = vpop.permute.xlu1 %662  ;;  %v615_v41 = vpop.permute.xlu0 %614 }
  0xa2   : > { %v903_v58 = vsel %vm902_vm7, %v886_v57, %v663_v40  ;;  %v887_v13 = vsel %vm885_vm6, %v870_v12, %v615_v41  ;;  %v820_v41 = vsel %vm817_vm2, %v1700_v1, %v1891_v25 }
  0xa3   : > { %577 = vrot.lane.b32.xlu1 %v355_v36, %s1623_s8  ;;  %386 = vrot.lane.b32.xlu0 %v353_v24, %s1622_s7  ;;  %v447_v24 = vsel %vm414_vm0, %v445_v17, %v446_v14  ;;  %v365_v17 = vsel %vm325_vm1, %v362_v55, %v364_v8 }
  0xa5   : > { %v1913_v43 = vpop.permute.xlu1 %509  ;;  %v1915_v44 = vpop.permute.xlu0 %461 }
  0xa6   : > { %v838_v60 = vsel %vm834_vm3, %v821_v59, %v1915_v44 }
  0xa7   : > { %783 = vrot.lane.b32.xlu1 %v444_v42, %s1627_s24  ;;  %628 = vrot.lane.b32.xlu0 %v442_v35, %s1624_s9 }
  0xa9   : > { %v717_v46 = vpop.permute.xlu1 %716  ;;  %v665_v47 = vpop.permute.xlu0 %664 }
  0xaa   : > { %v920_v63 = vsel %vm919_vm8, %v903_v58, %v717_v46  ;;  %v904_v15 = vsel %vm902_vm7, %v887_v13, %v665_v47 }
  0xab   : > { %475 = vrot.lane.b32.xlu1 %v442_v35, %s1621_s6  ;;  %388 = vrot.lane.b32.xlu0 %v355_v36, %s1622_s7 }
  0xad   : > { %v1928_v52 = vpop.permute.xlu1 %563  ;;  %v1930_v53 = vpop.permute.xlu0 %511 }
  0xaf   : > { %678 = vrot.lane.b32.xlu1 %v1925_v51, %s1625_s25  ;;  %630 = vrot.lane.b32.xlu0 %v444_v42, %s1624_s9 }
  0xb1   : > { %v770_v4 = vpop.permute.xlu1 %769  ;;  %v719_v5 = vpop.permute.xlu0 %718 }
  0xb2   : > { %v937_v6 = vsel %vm936_vm9, %v920_v63, %v770_v4  ;;  %v921_v20 = vsel %vm919_vm8, %v904_v15, %v719_v5  ;;  %v855_v4 = vsel %vm851_vm4, %v838_v60, %v1930_v53  ;;  %v451_v53 = vrot.slane %v2009_v2, 2  ;;  %v297_v60 = vld [vmem:[%s1694_s30 + $0xd0] sm:$0x3] }
  0xb3   : > { %525 = vrot.lane.b32.xlu1 %v1925_v51, %s1620_s5  ;;  %477 = vrot.lane.b32.xlu0 %v444_v42, %s1621_s6  ;;  %v837_v42 = vsel %vm834_vm3, %v820_v41, %v1904_v37 }
  0xb4   : > { %1488 = vmatprep.mubr.msk.f32.mxu0 %vm962_vm10, %v937_v6  ;;  %v854_v46 = vsel %vm851_vm4, %v837_v42, %v1913_v43  ;;  %v361_v43 = vrot.slane %v2000_v45, 1 }
  0xb5   : > { %v1956_v9 = vpop.permute.xlu1 %565  ;;  %v1958_v10 = vpop.permute.xlu0 %374  ;;  %v871_v1 = vsel %vm868_vm5, %v854_v46, %v1928_v52  ;;  %v296_v46 = vld [vmem:[%s1694_s30 + $0xc8] sm:$0xff] }
  0xb6   : > { %v363_v63 = vsel %vm325_vm1, %v361_v43, %v362_v55  ;;  %v872_v38 = vsel %vm868_vm5, %v855_v4, %v1956_v9  ;;  %v608_v4 = vrot.slane %v296_v46, 2 }
  0xb7   : > { %732 = vrot.lane.b32.xlu1 %v358_v7, %s1626_s12  ;;  %680 = vrot.lane.b32.xlu0 %v1933_v54, %s1625_s25 }
  0xb9   : > { %v772_v21 = vpop.permute.xlu1 %771  ;;  %v617_v22 = vpop.permute.xlu0 %616 }
  0xba   : > { %v938_v23 = vsel %vm936_vm9, %v921_v20, %v772_v21  ;;  %v888_v25 = vsel %vm885_vm6, %v871_v1, %v617_v22  ;;  %v453_v20 = vrot.slane %v294_v0, 2  ;;  %v557_v0 = vrot.slane %v297_v60, 1 }
  0xbb   : > { %579 = vrot.lane.b32.xlu1 %v358_v7, %s1623_s8  ;;  %527 = vrot.lane.b32.xlu0 %v1933_v54, %s1620_s5 }
  0xbc   : > { %1489 = vmatmul.mubr.msk.f32.vlgmr.msra.gmra.mxu0 %vm962_vm10, %v938_v23  ;;  %v454_v23 = vsel %vm414_vm0, %v451_v53, %v453_v20  ;;  %v299_v20 = vld [vmem:[%s1694_s30 + $0xe0] sm:$0xff] }
  0xbd   : > { %v1977_v27 = vpop.permute.xlu1 %463  ;;  %v1979_v29 = vpop.permute.xlu0 %376 }
  0xbf   : > { %785 = vrot.lane.b32.xlu1 %v447_v24, %s1627_s24  ;;  %734 = vrot.lane.b32.xlu0 %v360_v26, %s1626_s12 }
  0xc1   : > { %v667_v32 = vpop.permute.xlu1 %666  ;;  %v619_v33 = vpop.permute.xlu0 %618 }
  0xc2   : > { %v905_v37 = vsel %vm902_vm7, %v888_v25, %v667_v32  ;;  %v889_v6 = vsel %vm885_vm6, %v872_v38, %v619_v33  ;;  %v822_v33 = vsel %vm817_vm2, %v1749_v28, %v1958_v10  ;;  %v555_v25 = vrot.slane %v296_v46, 1 }
  0xc3   : > { %581 = vrot.lane.b32.xlu1 %v360_v26, %s1623_s8  ;;  %390 = vrot.lane.b32.xlu0 %v358_v7, %s1622_s7  ;;  %v450_v7 = vrot.slane %v2000_v45, 2 }
  0xc5   : > { %v1986_v35 = vpop.permute.xlu1 %513  ;;  %v1988_v36 = vpop.permute.xlu0 %465  ;;  %v452_v15 = vsel %vm414_vm0, %v450_v7, %v451_v53  ;;  %v558_v7 = vsel %vm325_vm1, %v555_v25, %v557_v0 }
  0xc7   : > { %787 = vrot.lane.b32.xlu1 %v449_v34, %s1627_s24  ;;  %632 = vrot.lane.b32.xlu0 %v447_v24, %s1624_s9 }
  0xc9   : > { %v721_v39 = vpop.permute.xlu1 %720  ;;  %v669_v40 = vpop.permute.xlu0 %668 }
  0xca   : > { %v922_v56 = vsel %vm919_vm8, %v905_v37, %v721_v39  ;;  %v906_v44 = vsel %vm902_vm7, %v889_v6, %v669_v40  ;;  %v295_v39 = vld [vmem:[%s1694_s30 + $0xc0] sm:$0xff] }
  0xcb   : > { %479 = vrot.lane.b32.xlu1 %v447_v24, %s1621_s6  ;;  %392 = vrot.lane.b32.xlu0 %v360_v26, %s1622_s7 }
  0xcd   : > { %v2004_v47 = vpop.permute.xlu1 %567  ;;  %v2006_v50 = vpop.permute.xlu0 %515 }
  0xcf   : > { %682 = vrot.lane.b32.xlu1 %v2000_v45, %s1625_s25  ;;  %634 = vrot.lane.b32.xlu0 %v449_v34, %s1624_s9 }
  0xd1   : > { %v774_v57 = vpop.permute.xlu1 %773  ;;  %v723_v58 = vpop.permute.xlu0 %722 }
  0xd2   : > { %v939_v52 = vsel %vm936_vm9, %v922_v56, %v774_v57  ;;  %v923_v11 = vsel %vm919_vm8, %v906_v44, %v723_v58 }
  0xd3   : > { %529 = vrot.lane.b32.xlu1 %v2000_v45, %s1620_s5  ;;  %481 = vrot.lane.b32.xlu0 %v449_v34, %s1621_s6  ;;  %v839_v34 = vsel %vm834_vm3, %v822_v33, %v1977_v27  ;;  %v554_v27 = vrot.slane %v295_v39, 1 }
  0xd4   : > { %1491 = vmatprep.mubr.msk.f32.mxu0 %vm962_vm10, %v939_v52  ;;  %v856_v40 = vsel %vm851_vm4, %v839_v34, %v1986_v35 }
  0xd5   : > { %v2034_v5 = vpop.permute.xlu1 %569  ;;  %v2036_v3 = vpop.permute.xlu0 %378  ;;  %v873_v1 = vsel %vm868_vm5, %v856_v40, %v2004_v47  ;;  %v823_v47 = vsel %vm817_vm2, %v1753_v30, %v1979_v29  ;;  %v556_v57 = vsel %vm325_vm1, %v554_v27, %v555_v25  ;;  %v765_v40 = vrot.slane %v299_v20, 2 }
  0xd6   : > { %v840_v56 = vsel %vm834_vm3, %v823_v47, %v1988_v36 }
  0xd7   : > { %736 = vrot.lane.b32.xlu1 %v363_v63, %s1626_s12  ;;  %684 = vrot.lane.b32.xlu0 %v2009_v2, %s1625_s25  ;;  %v857_v58 = vsel %vm851_vm4, %v840_v56, %v2006_v50 }
  0xd8   : > { %v874_v30 = vsel %vm868_vm5, %v857_v58, %v2034_v5 }
  0xd9   : > { %v776_v12 = vpop.permute.xlu1 %775  ;;  %v621_v13 = vpop.permute.xlu0 %620 }
  0xda   : > { %v940_v9 = vsel %vm936_vm9, %v923_v11, %v776_v12  ;;  %v890_v28 = vsel %vm885_vm6, %v873_v1, %v621_v13  ;;  %v610_v11 = vrot.slane %v297_v60, 2 }
  0xdb   : > { %583 = vrot.lane.b32.xlu1 %v363_v63, %s1623_s8  ;;  %531 = vrot.lane.b32.xlu0 %v2009_v2, %s1620_s5 }
  0xdc   : > { %1492 = vmatmul.mubr.msk.f32.gmra.mxu0 %vm962_vm10, %v940_v9  ;;  %v611_v9 = vsel %vm414_vm0, %v608_v4, %v610_v11 }
  0xdd   : > { %v2056_v14 = vpop.permute.xlu1 %467  ;;  %v2058_v18 = vpop.permute.xlu0 %380 }
  0xdf   : > { %789 = vrot.lane.b32.xlu1 %v452_v15, %s1627_s24  ;;  %738 = vrot.lane.b32.xlu0 %v365_v17, %s1626_s12 }
  0xe1   : > { %v671_v21 = vpop.permute.xlu1 %670  ;;  %v623_v22 = vpop.permute.xlu0 %622 }
  0xe2   : > { %v907_v10 = vsel %vm902_vm7, %v890_v28, %v671_v21  ;;  %v891_v29 = vsel %vm885_vm6, %v874_v30, %v623_v22  ;;  %v298_v21 = vld [vmem:[%s1694_s30 + $0xd8] sm:$0xff]  ;;  %v300_v22 = vld [vmem:[%s1694_s30 + $0xe8] sm:$0x3]  ;;  %s1421_s30 = sshll.u32 %s1606_s16, 1 }
  0xe3   : > { %585 = vrot.lane.b32.xlu1 %v365_v17, %s1623_s8  ;;  %394 = vrot.lane.b32.xlu0 %v363_v63, %s1622_s7  ;;  %v607_v63 = vrot.slane %v295_v39, 2  ;;  %v767_v27 = vrot.slane %v300_v22, 2 }
  0xe5   : > { %v2065_v24 = vpop.permute.xlu1 %517  ;;  %v2067_v26 = vpop.permute.xlu0 %469  ;;  %v609_v5 = vsel %vm414_vm0, %v607_v63, %v608_v4 }
  0xe7   : > { %791 = vrot.lane.b32.xlu1 %v454_v23, %s1627_s24  ;;  %636 = vrot.lane.b32.xlu0 %v452_v15, %s1624_s9 }
  0xe9   : > { %v725_v31 = vpop.permute.xlu1 %724  ;;  %v673_v32 = vpop.permute.xlu0 %672 }
  0xea   : > { %v924_v35 = vsel %vm919_vm8, %v907_v10, %v725_v31  ;;  %v908_v36 = vsel %vm902_vm7, %v891_v29, %v673_v32  ;;  %v711_v31 = vrot.slane %v298_v21, 1  ;;  %v714_v32 = vrot.slane %v300_v22, 1 }
  0xeb   : > { %483 = vrot.lane.b32.xlu1 %v452_v15, %s1621_s6  ;;  %396 = vrot.lane.b32.xlu0 %v365_v17, %s1622_s7 }
  0xed   : > { %v2081_v41 = vpop.permute.xlu1 %571  ;;  %v2083_v42 = vpop.permute.xlu0 %519 }
  0xef   : > { %686 = vrot.lane.b32.xlu1 %v295_v39, %s1625_s25  ;;  %638 = vrot.lane.b32.xlu0 %v454_v23, %s1624_s9 }
  0xf1   : > { %v778_v37 = vpop.permute.xlu1 %777  ;;  %v727_v43 = vpop.permute.xlu0 %726 }
  0xf2   : > { %v941_v55 = vsel %vm936_vm9, %v924_v35, %v778_v37  ;;  %v925_v50 = vsel %vm919_vm8, %v908_v36, %v727_v43  ;;  %v768_v43 = vsel %vm414_vm0, %v765_v40, %v767_v27 }
  0xf3   : > { %533 = vrot.lane.b32.xlu1 %v295_v39, %s1620_s5  ;;  %485 = vrot.lane.b32.xlu0 %v454_v23, %s1621_s6  ;;  %v712_v23 = vrot.slane %v299_v20, 1  ;;  %v824_v39 = vsel %vm817_vm2, %v1803_v48, %v2036_v3 }
  0xf4   : > { %1494 = vmatprep.mubr.msk.f32.mxu0 %vm962_vm10, %v941_v55  ;;  %v841_v1 = vsel %vm834_vm3, %v824_v39, %v2056_v14 }
  0xf5   : > { %v2105_v52 = vpop.permute.xlu1 %573  ;;  %v2107_v59 = vpop.permute.xlu0 %382  ;;  %v715_v28 = vsel %vm325_vm1, %v712_v23, %v714_v32  ;;  %v713_v10 = vsel %vm325_vm1, %v711_v31, %v712_v23  ;;  %v858_v25 = vsel %vm851_vm4, %v841_v1, %v2065_v24 }
  0xf6   : > { %v875_v48 = vsel %vm868_vm5, %v858_v25, %v2081_v41  ;;  %v825_v41 = vsel %vm817_vm2, %v1806_v49, %v2058_v18  ;;  %v826_v11 = vsel %vm817_vm2, %v1838_v61, %v2107_v59 }
  0xf7   : > { %740 = vrot.lane.b32.xlu1 %v556_v57, %s1626_s12  ;;  %688 = vrot.lane.b32.xlu0 %v296_v46, %s1625_s25  ;;  %v842_v58 = vsel %vm834_vm3, %v825_v41, %v2067_v26 }
  0xf8   : > { %v859_v60 = vsel %vm851_vm4, %v842_v58, %v2083_v42 }
  0xf9   : > { %v780_v38 = vpop.permute.xlu1 %779  ;;  %v625_v6 = vpop.permute.xlu0 %624  ;;  %v876_v36 = vsel %vm868_vm5, %v859_v60, %v2105_v52 }
  0xfa   : > { %v942_v44 = vsel %vm936_vm9, %v925_v50, %v780_v38  ;;  %v892_v3 = vsel %vm885_vm6, %v875_v48, %v625_v6 }
  0xfb   : > { %587 = vrot.lane.b32.xlu1 %v556_v57, %s1623_s8  ;;  %535 = vrot.lane.b32.xlu0 %v296_v46, %s1620_s5  ;;  %v764_v46 = vrot.slane %v298_v21, 2  ;;  %s249_s5 = sadd.s32 %s1602_s15, %s1421_s30 }
  0xfc   : > { %1495 = vmatmul.mubr.msk.f32.gmra.mxu0 %vm962_vm10, %v942_v44  ;;  %p250_p7 = scmp.lt.s32.totalorder %s249_s5, 3 }
  0xfd   : > { %v2123_v53 = vpop.permute.xlu1 %471  ;;  %v2125_v8 = vpop.permute.xlu0 %384  ;;  %v766_v55 = vsel %vm414_vm0, %v764_v46, %v765_v40 }
  0xfe   : > { %v827_v61 = vsel %vm817_vm2, %v1841_v62, %v2125_v8  ;;  %s2374_s5 = smov (!%p250_p7, %s249_s5), 3 }
  0xff   : > { %793 = vrot.lane.b32.xlu1 %v609_v5, %s1627_s24  ;;  %742 = vrot.lane.b32.xlu0 %v558_v7, %s1626_s12  ;;  %s1444_s15 = sshll.u32 %s2374_s5, 7  ;;  %s268_s28 = scalar_lea.vmem %s2362_s4, %s2374_s5 }
 0x100   : > { %s2248_s7 = scalar_lea.vmem %s2360_s2, %s1444_s15 }
 0x101   : > { %v675_v12 = vpop.permute.xlu1 %674  ;;  %v627_v13 = vpop.permute.xlu0 %626 }
 0x102   : > { %v909_v14 = vsel %vm902_vm7, %v892_v3, %v675_v12  ;;  %v893_v63 = vsel %vm885_vm6, %v876_v36, %v627_v13  ;;  %v843_v12 = vsel %vm834_vm3, %v826_v11, %v2123_v53 }
 0x103   : > { %640 = vrot.lane.b32.xlu1 %v609_v5, %s1624_s9  ;;  %589 = vrot.lane.b32.xlu0 %v558_v7, %s1623_s8 }
 0x105   : > { %v522_v15 = vpop.permute.xlu1 %521  ;;  %v2132_v17 = vpop.permute.xlu0 %473 }
 0x106   : > { %v860_v13 = vsel %vm851_vm4, %v843_v12, %v522_v15  ;;  %v844_v59 = vsel %vm834_vm3, %v827_v61, %v2132_v17 }
 0x107   : > { %642 = vrot.lane.b32.xlu1 %v611_v9, %s1624_s9  ;;  %795 = vrot.lane.b32.xlu0 %v611_v9, %s1627_s24 }
 0x109   : > { %v729_v33 = vpop.permute.xlu1 %728  ;;  %v677_v34 = vpop.permute.xlu0 %676 }
 0x10a   : > { %v926_v47 = vsel %vm919_vm8, %v909_v14, %v729_v33  ;;  %v910_v49 = vsel %vm902_vm7, %v893_v63, %v677_v34 }
 0x10b   : > { %692 = vrot.lane.b32.xlu1 %v299_v20, %s1625_s25  ;;  %690 = vrot.lane.b32.xlu0 %v298_v21, %s1625_s25  ;;  %s261_s25 = scalar_lea.vmem %s2361_s3, %s2374_s5 }
 0x10d   : > { %v576_v35 = vpop.permute.xlu1 %575  ;;  %v524_v37 = vpop.permute.xlu0 %523 }
 0x10e   : > { %v877_v21 = vsel %vm868_vm5, %v860_v13, %v576_v35  ;;  %v861_v53 = vsel %vm851_vm4, %v844_v59, %v524_v37 }
 0x10f   : > { %746 = vrot.lane.b32.xlu1 %v715_v28, %s1626_s12  ;;  %744 = vrot.lane.b32.xlu0 %v713_v10, %s1626_s12 }
 0x111   : > { %v782_v24 = vpop.permute.xlu1 %781  ;;  %v731_v56 = vpop.permute.xlu0 %730 }
 0x112   : > { %v943_v57 = vsel %vm936_vm9, %v926_v47, %v782_v24  ;;  %v927_v18 = vsel %vm919_vm8, %v910_v49, %v731_v56 }
 0x113   : > { %799 = vrot.lane.b32.xlu1 %v768_v43, %s1627_s24  ;;  %797 = vrot.lane.b32.xlu0 %v766_v55, %s1627_s24 }
 0x114   : > { %1497 = vmatprep.mubr.msk.f32.mxu0 %vm962_vm10, %v943_v57 }
 0x115   : > { %v578_v30 = vpop.permute.xlu1 %577  ;;  %v387_v29 = vpop.permute.xlu0 %386 }
 0x116   : > { %v878_v40 = vsel %vm868_vm5, %v861_v53, %v578_v30  ;;  %v828_v43 = vsel %vm817_vm2, %v1875_v16, %v387_v29 }
 0x119   : > { %v784_v4 = vpop.permute.xlu1 %783  ;;  %v629_v0 = vpop.permute.xlu0 %628 }
 0x11a   : > { %v944_v26 = vsel %vm936_vm9, %v927_v18, %v784_v4  ;;  %v894_v22 = vsel %vm885_vm6, %v877_v21, %v629_v0 }
 0x11b   : > { %1498 = vmatmul.mubr.msk.f32.gmra.mxu0 %vm962_vm10, %v944_v26 }
 0x11d   : > { %v476_v50 = vpop.permute.xlu1 %475  ;;  %v389_v38 = vpop.permute.xlu0 %388 }
 0x11e   : > { %v845_v55 = vsel %vm834_vm3, %v828_v43, %v476_v50  ;;  %v829_v16 = vsel %vm817_vm2, %v1878_v19, %v389_v38 }
 0x121   : > { %v679_v42 = vpop.permute.xlu1 %678  ;;  %v631_v6 = vpop.permute.xlu0 %630 }
 0x122   : > { %v911_v23 = vsel %vm902_vm7, %v894_v22, %v679_v42  ;;  %v895_v46 = vsel %vm885_vm6, %v878_v40, %v631_v6 }
 0x125   : > { %v526_v44 = vpop.permute.xlu1 %525  ;;  %v478_v5 = vpop.permute.xlu0 %477 }
 0x126   : > { %v862_v47 = vsel %vm851_vm4, %v845_v55, %v526_v44  ;;  %v846_v29 = vsel %vm834_vm3, %v829_v16, %v478_v5 }
 0x129   : > { %v733_v7 = vpop.permute.xlu1 %732  ;;  %v681_v52 = vpop.permute.xlu0 %680 }
 0x12a   : > { %v928_v31 = vsel %vm919_vm8, %v911_v23, %v733_v7  ;;  %v912_v1 = vsel %vm902_vm7, %v895_v46, %v681_v52 }
 0x12d   : > { %v580_v9 = vpop.permute.xlu1 %579  ;;  %v528_v20 = vpop.permute.xlu0 %527 }
 0x12e   : > { %v879_v57 = vsel %vm868_vm5, %v862_v47, %v580_v9  ;;  %v863_v49 = vsel %vm851_vm4, %v846_v29, %v528_v20 }
 0x131   : > { %v786_v32 = vpop.permute.xlu1 %785  ;;  %v735_v33 = vpop.permute.xlu0 %734 }
 0x132   : > { %v945_v34 = vsel %vm936_vm9, %v928_v31, %v786_v32  ;;  %v929_v28 = vsel %vm919_vm8, %v912_v1, %v735_v33 }
 0x133   : > { %1500 = vmatprep.mubr.msk.f32.mxu1 %vm962_vm10, %v945_v34 }
 0x135   : > { %v582_v15 = vpop.permute.xlu1 %581  ;;  %v391_v39 = vpop.permute.xlu0 %390 }
 0x136   : > { %v880_v0 = vsel %vm868_vm5, %v863_v49, %v582_v15  ;;  %v830_v20 = vsel %vm817_vm2, %v1925_v51, %v391_v39 }
 0x139   : > { %v788_v10 = vpop.permute.xlu1 %787  ;;  %v633_v27 = vpop.permute.xlu0 %632 }
 0x13a   : > { %v946_v62 = vsel %vm936_vm9, %v929_v28, %v788_v10  ;;  %v896_v41 = vsel %vm885_vm6, %v879_v57, %v633_v27 }
 0x13b   : > { %1501 = vmatmul.mubr.msk.f32.vlgmr.msra.gmra.mxu1 %vm962_vm10, %v946_v62 }
 0x13d   : > { %v480_v8 = vpop.permute.xlu1 %479  ;;  %v393_v17 = vpop.permute.xlu0 %392 }
 0x13e   : > { %v847_v21 = vsel %vm834_vm3, %v830_v20, %v480_v8  ;;  %v831_v15 = vsel %vm817_vm2, %v1933_v54, %v393_v17 }
 0x141   : > { %v683_v25 = vpop.permute.xlu1 %682  ;;  %v635_v35 = vpop.permute.xlu0 %634 }
 0x142   : > { %v913_v58 = vsel %vm902_vm7, %v896_v41, %v683_v25  ;;  %v897_v26 = vsel %vm885_vm6, %v880_v0, %v635_v35 }
 0x145   : > { %v530_v37 = vpop.permute.xlu1 %529  ;;  %v482_v48 = vpop.permute.xlu0 %481 }
 0x146   : > { %v864_v22 = vsel %vm851_vm4, %v847_v21, %v530_v37  ;;  %v848_v39 = vsel %vm834_vm3, %v831_v15, %v482_v48 }
 0x149   : > { %v737_v3 = vpop.permute.xlu1 %736  ;;  %v685_v14 = vpop.permute.xlu0 %684 }
 0x14a   : > { %v930_v60 = vsel %vm919_vm8, %v913_v58, %v737_v3  ;;  %v914_v50 = vsel %vm902_vm7, %v897_v26, %v685_v14 }
 0x14d   : > { %v584_v24 = vpop.permute.xlu1 %583  ;;  %v532_v56 = vpop.permute.xlu0 %531 }
 0x14e   : > { %v881_v32 = vsel %vm868_vm5, %v864_v22, %v584_v24  ;;  %v865_v40 = vsel %vm851_vm4, %v848_v39, %v532_v56 }
 0x151   : > { %v790_v30 = vpop.permute.xlu1 %789  ;;  %v739_v36 = vpop.permute.xlu0 %738 }
 0x152   : > { %v947_v63 = vsel %vm936_vm9, %v930_v60, %v790_v30  ;;  %v931_v42 = vsel %vm919_vm8, %v914_v50, %v739_v36 }
 0x153   : > { %1503 = vmatprep.mubr.msk.f32.mxu1 %vm962_vm10, %v947_v63 }
 0x155   : > { %v586_v18 = vpop.permute.xlu1 %585  ;;  %v395_v4 = vpop.permute.xlu0 %394 }
 0x156   : > { %v882_v28 = vsel %vm868_vm5, %v865_v40, %v586_v18  ;;  %v832_v3 = vsel %vm817_vm2, %v2000_v45, %v395_v4 }
 0x159   : > { %v792_v6 = vpop.permute.xlu1 %791  ;;  %v637_v19 = vpop.permute.xlu0 %636 }
 0x15a   : > { %v948_v38 = vsel %vm936_vm9, %v931_v42, %v792_v6  ;;  %v898_v33 = vsel %vm885_vm6, %v881_v32, %v637_v19 }
 0x15b   : > { %1504 = vmatmul.mubr.msk.f32.gmra.mxu1 %vm962_vm10, %v948_v38 }
 0x15d   : > { %v484_v44 = vpop.permute.xlu1 %483  ;;  %v397_v5 = vpop.permute.xlu0 %396 }
 0x15e   : > { %v833_v43 = vsel %vm817_vm2, %v2009_v2, %v397_v5  ;;  %v849_v56 = vsel %vm834_vm3, %v832_v3, %v484_v44 }
 0x161   : > { %v687_v7 = vpop.permute.xlu1 %686  ;;  %v639_v52 = vpop.permute.xlu0 %638 }
 0x162   : > { %v915_v34 = vsel %vm902_vm7, %v898_v33, %v687_v7  ;;  %v899_v10 = vsel %vm885_vm6, %v882_v28, %v639_v52 }
 0x165   : > { %v534_v11 = vpop.permute.xlu1 %533  ;;  %v486_v12 = vpop.permute.xlu0 %485 }
 0x166   : > { %v850_v57 = vsel %vm834_vm3, %v833_v43, %v486_v12  ;;  %v866_v58 = vsel %vm851_vm4, %v849_v56, %v534_v11 }
 0x169   : > { %v741_v13 = vpop.permute.xlu1 %740  ;;  %v689_v9 = vpop.permute.xlu0 %688 }
 0x16a   : > { %v932_v61 = vsel %vm919_vm8, %v915_v34, %v741_v13  ;;  %v916_v27 = vsel %vm902_vm7, %v899_v10, %v689_v9 }
 0x16d   : > { %v588_v23 = vpop.permute.xlu1 %587  ;;  %v536_v31 = vpop.permute.xlu0 %535 }
 0x16e   : > { %v867_v45 = vsel %vm851_vm4, %v850_v57, %v536_v31  ;;  %v883_v63 = vsel %vm868_vm5, %v866_v58, %v588_v23 }
 0x171   : > { %v794_v59 = vpop.permute.xlu1 %793  ;;  %v743_v53 = vpop.permute.xlu0 %742 }
 0x172   : > { %v949_v51 = vsel %vm936_vm9, %v932_v61, %v794_v59  ;;  %v933_v54 = vsel %vm919_vm8, %v916_v27, %v743_v53 }
 0x173   : > { %1506 = vmatprep.mubr.msk.f32.mxu1 %vm962_vm10, %v949_v51 }
 0x175   : > { %v641_v46 = vpop.permute.xlu1 %640  ;;  %v590_v1 = vpop.permute.xlu0 %589 }
 0x176   : > { %v884_v16 = vsel %vm868_vm5, %v867_v45, %v590_v1  ;;  %v900_v49 = vsel %vm885_vm6, %v883_v63, %v641_v46 }
 0x179   : > { %v643_v62 = vpop.permute.xlu1 %642  ;;  %v796_v8 = vpop.permute.xlu0 %795 }
 0x17a   : > { %v950_v17 = vsel %vm936_vm9, %v933_v54, %v796_v8  ;;  %v901_v18 = vsel %vm885_vm6, %v884_v16, %v643_v62 }
 0x17b   : > { %1507 = vmatmul.mubr.msk.f32.gmra.mxu1 %vm962_vm10, %v950_v17 }
 0x17c   : > { %v1490_v25 = vpop.f32.mrf.mxu0 }
 0x17d   : > { %1157 = vst.msk [vmem:[%s2248_s7 + $0x8] sm:$0xff] %vm817_vm2, %v1490_v25  ;;  %v1212_v35 = vmul.f32 %v1490_v25, %v1490_v25  ;;  %v693_v37 = vpop.permute.xlu1 %692  ;;  %v691_v48 = vpop.permute.xlu0 %690  ;;  %v1173_v55 = vsel %vm817_vm2, %v1490_v25, 0.0 }
 0x17e   : > { %v1077_v14 = vpop.f32.mrf.mxu0  ;;  %v918_v4 = vsel %vm902_vm7, %v901_v18, %v693_v37  ;;  %v917_v0 = vsel %vm902_vm7, %v900_v49, %v691_v48 }
 0x17f   : > { %1156 = vst.msk [vmem:[%s2248_s7] sm:$0xff] %vm817_vm2, %v1077_v14  ;;  %v1172_v47 = vsel %vm817_vm2, %v1077_v14, 0.0  ;;  %v1211_v24 = vmul.f32 %v1077_v14, %v1077_v14  ;;  %v1228_v60 = vsel %vm817_vm2, %v1212_v35, 0.0 }
 0x180   : > { %v1174_v41 = vadd.f32 %v1173_v55, %v1172_v47 }
 0x181   : > { %v1227_v2 = vsel %vm817_vm2, %v1211_v24, 0.0  ;;  %v747_v30 = vpop.permute.xlu1 %746  ;;  %v745_v36 = vpop.permute.xlu0 %744 }
 0x182   : > { %v1229_v29 = vadd.f32 %v1228_v60, %v1227_v2  ;;  %v935_v26 = vsel %vm919_vm8, %v918_v4, %v747_v30  ;;  %v934_v50 = vsel %vm919_vm8, %v917_v0, %v745_v36 }
 0x185   : > { %v800_v42 = vpop.permute.xlu1 %799  ;;  %v798_v6 = vpop.permute.xlu0 %797 }
 0x186   : > { %v952_v19 = vsel %vm936_vm9, %v935_v26, %v800_v42  ;;  %v951_v38 = vsel %vm936_vm9, %v934_v50, %v798_v6 }
 0x187   : > { %1509 = vmatprep.mubr.msk.f32.mxu1 %vm962_vm10, %v951_v38 }
 0x188   : > { %1510 = vmatmul.mubr.msk.f32.gmra.mxu1 %vm962_vm10, %v952_v19 }
 0x19c   : > { %v1493_v44 = vpop.f32.mrf.mxu0 }
 0x19d   : > { %1159 = vst.msk [vmem:[%s2248_s7 + $0x18] sm:$0xff] %vm817_vm2, %v1493_v44  ;;  %v1214_v7 = vmul.f32 %v1493_v44, %v1493_v44  ;;  %v1177_v13 = vsel %vm817_vm2, %v1493_v44, 0.0 }
 0x19e   : > { %v1087_v5 = vpop.f32.mrf.mxu0 }
 0x19f   : > { %1158 = vst.msk [vmem:[%s2248_s7 + $0x10] sm:$0xff] %vm817_vm2, %v1087_v5  ;;  %v1175_v52 = vsel %vm817_vm2, %v1087_v5, 0.0  ;;  %v1213_v11 = vmul.f32 %v1087_v5, %v1087_v5  ;;  %v1232_v22 = vsel %vm817_vm2, %v1214_v7, 0.0 }
 0x1a0   : > { %v1176_v12 = vadd.f32 %v1175_v52, %v1174_v41 }
 0x1a1   : > { %v1230_v9 = vsel %vm817_vm2, %v1213_v11, 0.0 }
 0x1a2   : > { %v1231_v20 = vadd.f32 %v1230_v9, %v1229_v29  ;;  %v1178_v21 = vadd.f32 %v1177_v13, %v1176_v12 }
 0x1a4   : > { %v1233_v23 = vadd.f32 %v1232_v22, %v1231_v20 }
 0x1bc   : > { %v1496_v31 = vpop.f32.mrf.mxu0 }
 0x1bd   : > { %1161 = vst.msk [vmem:[%s2248_s7 + $0x28] sm:$0xff] %vm817_vm2, %v1496_v31  ;;  %v1216_v33 = vmul.f32 %v1496_v31, %v1496_v31  ;;  %v1181_v53 = vsel %vm817_vm2, %v1496_v31, 0.0 }
 0x1be   : > { %v1097_v32 = vpop.f32.mrf.mxu0 }
 0x1bf   : > { %1160 = vst.msk [vmem:[%s2248_s7 + $0x20] sm:$0xff] %vm817_vm2, %v1097_v32  ;;  %v1179_v34 = vsel %vm817_vm2, %v1097_v32, 0.0  ;;  %v1215_v61 = vmul.f32 %v1097_v32, %v1097_v32  ;;  %v1236_v40 = vsel %vm817_vm2, %v1216_v33, 0.0 }
 0x1c0   : > { %v1180_v59 = vadd.f32 %v1179_v34, %v1178_v21 }
 0x1c1   : > { %v1234_v51 = vsel %vm817_vm2, %v1215_v61, 0.0 }
 0x1c2   : > { %v1235_v15 = vadd.f32 %v1234_v51, %v1233_v23  ;;  %v1182_v39 = vadd.f32 %v1181_v53, %v1180_v59 }
 0x1c4   : > { %v1237_v46 = vadd.f32 %v1236_v40, %v1235_v15 }
 0x1db   : > { %v1499_v1 = vpop.f32.mrf.mxu0 }
 0x1dc   : > { %1163 = vst.msk [vmem:[%s2248_s7 + $0x38] sm:$0xff] %vm817_vm2, %v1499_v1  ;;  %v1218_v10 = vmul.f32 %v1499_v1, %v1499_v1  ;;  %v1185_v8 = vsel %vm817_vm2, %v1499_v1, 0.0 }
 0x1dd   : > { %v1107_v28 = vpop.f32.mrf.mxu0 }
 0x1de   : > { %1162 = vst.msk [vmem:[%s2248_s7 + $0x30] sm:$0xff] %vm817_vm2, %v1107_v28  ;;  %v1183_v27 = vsel %vm817_vm2, %v1107_v28, 0.0  ;;  %v1217_v54 = vmul.f32 %v1107_v28, %v1107_v28  ;;  %v1240_v37 = vsel %vm817_vm2, %v1218_v10, 0.0 }
 0x1df   : > { %v1184_v62 = vadd.f32 %v1183_v27, %v1182_v39 }
 0x1e0   : > { %v1238_v17 = vsel %vm817_vm2, %v1217_v54, 0.0 }
 0x1e1   : > { %v1186_v25 = vadd.f32 %v1185_v8, %v1184_v62  ;;  %v1239_v35 = vadd.f32 %v1238_v17, %v1237_v46 }
 0x1e3   : > { %v1241_v48 = vadd.f32 %v1240_v37, %v1239_v35 }
 0x1fb   : > { %v1502_v3 = vpop.f32.mrf.mxu1 }
 0x1fc   : > { %1165 = vst.msk [vmem:[%s2248_s7 + $0x48] sm:$0xff] %vm817_vm2, %v1502_v3  ;;  %v1220_v43 = vmul.f32 %v1502_v3, %v1502_v3  ;;  %v1189_v56 = vsel %vm817_vm2, %v1502_v3, 0.0 }
 0x1fd   : > { %v1117_v14 = vpop.f32.mrf.mxu1 }
 0x1fe   : > { %1164 = vst.msk [vmem:[%s2248_s7 + $0x40] sm:$0xff] %vm817_vm2, %v1117_v14  ;;  %v1187_v55 = vsel %vm817_vm2, %v1117_v14, 0.0  ;;  %v1219_v47 = vmul.f32 %v1117_v14, %v1117_v14  ;;  %v1244_v45 = vsel %vm817_vm2, %v1220_v43, 0.0 }
 0x1ff   : > { %v1188_v24 = vadd.f32 %v1187_v55, %v1186_v25 }
 0x200   : > { %v1242_v57 = vsel %vm817_vm2, %v1219_v47, 0.0 }
 0x201   : > { %v1243_v41 = vadd.f32 %v1242_v57, %v1241_v48  ;;  %v1190_v58 = vadd.f32 %v1189_v56, %v1188_v24 }
 0x203   : > { %v1245_v60 = vadd.f32 %v1244_v45, %v1243_v41 }
 0x21b   : > { %v1505_v2 = vpop.f32.mrf.mxu1 }
 0x21c   : > { %1167 = vst.msk [vmem:[%s2248_s7 + $0x58] sm:$0xff] %vm817_vm2, %v1505_v2  ;;  %v1222_v4 = vmul.f32 %v1505_v2, %v1505_v2  ;;  %v1193_v50 = vsel %vm817_vm2, %v1505_v2, 0.0 }
 0x21d   : > { %v1127_v30 = vpop.f32.mrf.mxu1 }
 0x21e   : > { %1166 = vst.msk [vmem:[%s2248_s7 + $0x50] sm:$0xff] %vm817_vm2, %v1127_v30  ;;  %v1221_v36 = vmul.f32 %v1127_v30, %v1127_v30  ;;  %v1191_v16 = vsel %vm817_vm2, %v1127_v30, 0.0  ;;  %v1248_v19 = vsel %vm817_vm2, %v1222_v4, 0.0 }
 0x21f   : > { %v1192_v18 = vadd.f32 %v1191_v16, %v1190_v58 }
 0x220   : > { %v1246_v49 = vsel %vm817_vm2, %v1221_v36, 0.0 }
 0x221   : > { %v1247_v26 = vadd.f32 %v1246_v49, %v1245_v60  ;;  %v1194_v6 = vadd.f32 %v1193_v50, %v1192_v18 }
 0x223   : > { %v1249_v5 = vadd.f32 %v1248_v19, %v1247_v26 }
 0x23b   : > { %v1508_v63 = vpop.f32.mrf.mxu1 }
 0x23c   : > { %1169 = vst.msk [vmem:[%s2248_s7 + $0x68] sm:$0xff] %vm817_vm2, %v1508_v63  ;;  %v1224_v7 = vmul.f32 %v1508_v63, %v1508_v63  ;;  %v1197_v12 = vsel %vm817_vm2, %v1508_v63, 0.0 }
 0x23d   : > { %v1137_v29 = vpop.f32.mrf.mxu1 }
 0x23e   : > { %1168 = vst.msk [vmem:[%s2248_s7 + $0x60] sm:$0xff] %vm817_vm2, %v1137_v29  ;;  %v1223_v0 = vmul.f32 %v1137_v29, %v1137_v29  ;;  %v1195_v42 = vsel %vm817_vm2, %v1137_v29, 0.0  ;;  %v1252_v20 = vsel %vm817_vm2, %v1224_v7, 0.0 }
 0x23f   : > { %v1196_v44 = vadd.f32 %v1195_v42, %v1194_v6 }
 0x240   : > { %v1250_v38 = vsel %vm817_vm2, %v1223_v0, 0.0 }
 0x241   : > { %v1251_v52 = vadd.f32 %v1250_v38, %v1249_v5  ;;  %v1198_v9 = vadd.f32 %v1197_v12, %v1196_v44 }
 0x243   : > { %v1253_v32 = vadd.f32 %v1252_v20, %v1251_v52 }
 0x248   : > { %v1511_v11 = vpop.f32.mrf.mxu1 }
 0x249   : > { %1171 = vst.msk [vmem:[%s2248_s7 + $0x78] sm:$0xff] %vm817_vm2, %v1511_v11  ;;  %v1226_v21 = vmul.f32 %v1511_v11, %v1511_v11  ;;  %v1201_v33 = vsel %vm817_vm2, %v1511_v11, 0.0 }
 0x24a   : > { %v1147_v13 = vpop.f32.mrf.mxu1 }
 0x24b   : > { %1170 = vst.msk [vmem:[%s2248_s7 + $0x70] sm:$0xff] %vm817_vm2, %v1147_v13  ;;  %v1199_v22 = vsel %vm817_vm2, %v1147_v13, 0.0  ;;  %v1225_v23 = vmul.f32 %v1147_v13, %v1147_v13  ;;  %v1256_v53 = vsel %vm817_vm2, %v1226_v21, 0.0 }
 0x24c   : > { %v1200_v31 = vadd.f32 %v1199_v22, %v1198_v9 }
 0x24d   : > { %v1254_v34 = vsel %vm817_vm2, %v1225_v23, 0.0 }
 0x24e   : > { %v1202_v61 = vadd.f32 %v1201_v33, %v1200_v31  ;;  %v1255_v59 = vadd.f32 %v1254_v34, %v1253_v32 }
 0x250   : > { %v1203_v51 = vrot.slane %v1202_v61, 4  ;;  %v1257_v15 = vadd.f32 %v1256_v53, %v1255_v59 }
 0x252   : > { %v1204_v39 = vadd.f32 %v1203_v51, %v1202_v61  ;;  %v1258_v40 = vrot.slane %v1257_v15, 4 }
 0x254   : > { %v1205_v46 = vrot.slane %v1204_v39, 2  ;;  %v1259_v1 = vadd.f32 %v1258_v40, %v1257_v15 }
 0x256   : > { %v1206_v28 = vadd.f32 %v1205_v46, %v1204_v39  ;;  %v1260_v10 = vrot.slane %v1259_v1, 2 }
 0x258   : > { %v1207_v27 = vrot.slane %v1206_v28, 1  ;;  %v1261_v54 = vadd.f32 %v1260_v10, %v1259_v1 }
 0x25a   : > { %v1208_v62 = vadd.f32 %v1207_v27, %v1206_v28  ;;  %v1262_v8 = vrot.slane %v1261_v54, 1 }
 0x25c   : > { %1210 = vst.msk [vmem:[%s261_s25] sm:$0x1] %vm1209_vm11, %v1208_v62  ;;  %v1263_v17 = vadd.f32 %v1262_v8, %v1261_v54 }
 0x25e   : > { %1264 = vst.msk [vmem:[%s268_s28] sm:$0x1] %vm1209_vm11, %v1263_v17 }
 0x25f PF: > { %s15_s19 = sadd.s32 1, %s1618_s19   ;;  %s2363_s15 = smov %s1610_s17 }
 0x260   : > { %p12_p8 = scmp.ge.s32.totalorder %s15_s19, 6   ;;  %s2364_s16 = smov %s1614_s18 }
 0x261   : > { %s2365_s17 = smov %s2368_s20  ;;  %s2366_s18 = smov %s2372_s21 }
 0x262   :  { %14 = sbr.rel (!%p12_p8) target bundleno = 3 (0x3), region = 82 }

</bundles_post_ra>
